<compile_context>
chip_gen: v7x
topology: tpu7x:2x2x1
jax: 0.10.0
libtpu: 0.0.40
codegen_flags: <defaults>
</compile_context>

<pallas_src>
import functools
import math

import jax
import jax.numpy as jnp
from jax.experimental import pallas as pl
from jax.experimental.pallas import tpu as pltpu  # noqa: F401  (TPU backend)

# ---- small synthetic config (consistent with the module's __init__) ----
VOCAB = 100
DIM = 32          # d_model
DEPTH = 2
MAX_SEQ = 16
HEADS = 4         # d_k = DIM // HEADS = 8
NUM_LABELS = 2
B = 2
S = 8
LANES = 128       # packed-parameter / padded-output lane width (== 4*DIM)

assert LANES >= 4 * DIM and LANES >= 3 * DIM


# ----------------------------- fused Pallas kernel -----------------------------

def fused_mrc_kernel(x_ref, amask_ref,
                     wqkv_ref, wo_ref, w1_ref, w2_ref, misc_ref,
                     dense_w_ref, out_w_ref, head_misc_ref,
                     out_ref, *, depth, head_num):
    """Full encoder stack + final LayerNorm + MRC head, one invocation, no grid."""
    bs = x_ref.shape[0]                       # B*S
    d = x_ref.shape[-1]                       # D
    dk = d // head_num
    scale = 1.0 / math.sqrt(dk)
    eps = 1e-6

    x = x_ref[...]                            # (B*S, D) f32, stays resident
    amask = amask_ref[...]                    # (B*S, B*S) int32; 1 = may attend

    def ln_custom(v, gamma, beta):
        # torch custom LayerNorm: gamma*(x-mean)/(std+eps)+beta, Bessel-corrected std
        m = jnp.mean(v, axis=-1, keepdims=True)
        c = v - m
        std = jnp.sqrt(jnp.sum(c * c, axis=-1, keepdims=True) / (d - 1))
        return gamma * c / (std + eps) + beta

    for l in range(depth):                    # DEPTH=2, statically unrolled
        wqkv = wqkv_ref[l]                    # (D, 3D)
        wo = wo_ref[l]                        # (D, D)
        w1 = w1_ref[l]                        # (D, 4D)
        w2 = w2_ref[l]                        # (4D, D)
        misc = misc_ref[l]                    # (8, LANES) packed params
        bqkv = misc[0:1, :3 * d]              # (1, 3D)
        b1 = misc[1:2, :4 * d]                # (1, 4D)
        bo = misc[2:3, :d]                    # (1, D)
        b2 = misc[3:4, :d]                    # (1, D)
        ln1a, ln1b = misc[4:5, :d], misc[5:6, :d]
        ln2a, ln2b = misc[6:7, :d], misc[7:8, :d]

        # ---- residual 1: x + MHA(LN(x)) ----
        xn = ln_custom(x, ln1a, ln1b)
        qkv = jnp.dot(xn, wqkv, preferred_element_type=jnp.float32) + bqkv  # (B*S, 3D)

        attn_out = jnp.zeros((bs, d), jnp.float32)
        for h in range(head_num):             # HEADS=4, unrolled; all matmuls 2-D
            qh = qkv[:, h * dk:(h + 1) * dk]                  # (B*S, dk)
            kh = qkv[:, d + h * dk:d + (h + 1) * dk]          # (B*S, dk)
            vh = qkv[:, 2 * d + h * dk:2 * d + (h + 1) * dk]  # (B*S, dk)
            s = jax.lax.dot_general(qh, kh, (((1,), (1,)), ((), ())),
                                    preferred_element_type=jnp.float32) * scale
            # block-diagonal + key-padding mask (exactly masked_fill(mask==0, -1e20))
            s = jnp.where(amask != 0, s, -1e20)
            s = s - jnp.max(s, axis=-1, keepdims=True)
            p = jnp.exp(s)
            p = p / jnp.sum(p, axis=-1, keepdims=True)
            oh = jnp.dot(p, vh, preferred_element_type=jnp.float32)          # (B*S, dk)
            attn_out = attn_out + jnp.dot(oh, wo[h * dk:(h + 1) * dk, :],
                                          preferred_element_type=jnp.float32)
        x = x + attn_out + bo

        # ---- residual 2: x + FFN(LN(x)) ----
        xn2 = ln_custom(x, ln2a, ln2b)
        hdn = jnp.dot(xn2, w1, preferred_element_type=jnp.float32) + b1       # (B*S, 4D)
        hdn = jnp.maximum(hdn, 0.0)                                           # ReLU
        ff = jnp.dot(hdn, w2, preferred_element_type=jnp.float32) + b2
        x = x + ff

    # ---- final nn.LayerNorm (biased variance, eps=1e-5) + MRC head ----
    ln_w = head_misc_ref[0:1, :d]
    ln_b = head_misc_ref[1:2, :d]
    dense_b = head_misc_ref[2:3, :d]
    out_b = head_misc_ref[3:4, :]              # (1, LANES), zero beyond NUM_LABELS
    m = jnp.mean(x, axis=-1, keepdims=True)
    c = x - m
    var = jnp.mean(c * c, axis=-1, keepdims=True)
    xn = c * jax.lax.rsqrt(var + 1e-5) * ln_w + ln_b

    hdn = jnp.dot(xn, dense_w_ref[...], preferred_element_type=jnp.float32) + dense_b
    hdn = 0.5 * hdn * (1.0 + jax.lax.erf(hdn / math.sqrt(2.0)))               # exact gelu
    logits = jnp.dot(hdn, out_w_ref[...], preferred_element_type=jnp.float32) + out_b
    out_ref[...] = logits.astype(out_ref.dtype)                               # lane-dense store


# ------------------------------- wrappers ---------------------------------

def _cost_estimate(args, out_nbytes):
    dk = DIM // HEADS
    bs = B * S
    flops = 0
    for _ in range(DEPTH):
        flops += 2 * bs * DIM * 3 * DIM               # fused QKV projection
        flops += HEADS * 2 * bs * bs * dk * 2         # scores + p@v (flattened B*S)
        flops += 2 * bs * DIM * DIM                   # output projection
        flops += 2 * bs * DIM * 4 * DIM * 2           # FFN
    flops += 2 * bs * DIM * DIM                       # head dense
    flops += 2 * bs * DIM * LANES                     # head out_proj (padded)
    trans = DEPTH * HEADS * bs * bs + bs * DIM
    byt = sum(int(a.size) * a.dtype.itemsize for a in args) + out_nbytes
    return pl.CostEstimate(flops=flops, transcendentals=trans, bytes_accessed=byt)


def transformer_mrc_forward(params, input_ids, input_mask):
    """Inference path of TransformerMRCModel.forward -> (start_logits, end_logits)."""
    b, s = input_ids.shape
    d = DIM
    # embeddings (gather glue in plain JAX)
    x = jnp.take(params["tok_emb"], input_ids, axis=0)          # (B, S, D)
    x = x + params["pos_emb"][:s][None, :, :]
    x2d = x.reshape(b * s, d).astype(jnp.float32)               # flat (B*S, D) slab

    # Precompute the flattened attention-validity mask (B*S, B*S):
    # within-batch block diagonal AND key-padding mask (broadcast over heads/queries,
    # exactly as mask.unsqueeze(1) in the PyTorch module).
    key_valid = input_mask.reshape(b, s).astype(jnp.int32) != 0
    batch_id = jnp.repeat(jnp.arange(b), s)                     # (B*S,)
    same_batch = batch_id[:, None] == batch_id[None, :]         # (B*S, B*S)
    amask = (same_batch & key_valid.reshape(b * s)[None, :]).astype(jnp.int32)

    args = (x2d, amask, params["wqkv"], params["wo"], params["w1"], params["w2"],
            params["misc"], params["dense_w"], params["out_w"], params["head_misc"])
    kernel = functools.partial(fused_mrc_kernel, depth=DEPTH, head_num=HEADS)
    out = pl.pallas_call(
        kernel,
        out_shape=jax.ShapeDtypeStruct((b * s, LANES), jnp.float32),
        cost_estimate=_cost_estimate(args, b * s * LANES * 4),
    )(*args)

    logits = out[:, :NUM_LABELS].reshape(b, s, NUM_LABELS)      # (B, S, 2)
    start_logits = logits[..., 0]
    end_logits = logits[..., 1]
    return start_logits, end_logits


def init_params(key):
    """Deterministic synthetic parameters, packed for the fused kernel."""
    d = DIM
    keys = iter(jax.random.split(key, 64))

    def rnd(shape, scale=0.02):
        return (scale * jax.random.normal(next(keys), shape)).astype(jnp.float32)

    tok_emb = rnd((VOCAB, d))
    pos_emb = rnd((MAX_SEQ, d))

    wqkv_l, wo_l, w1_l, w2_l, misc_l = [], [], [], [], []
    for _ in range(DEPTH):
        wq, bq = rnd((d, d)), rnd((d,))
        wk, bk = rnd((d, d)), rnd((d,))
        wv, bv = rnd((d, d)), rnd((d,))
        wo, bo = rnd((d, d)), rnd((d,))
        w1, b1 = rnd((d, 4 * d)), rnd((4 * d,))
        w2, b2 = rnd((4 * d, d)), rnd((d,))
        ln1a, ln1b = jnp.ones((d,), jnp.float32), jnp.zeros((d,), jnp.float32)
        ln2a, ln2b = jnp.ones((d,), jnp.float32), jnp.zeros((d,), jnp.float32)

        wqkv_l.append(jnp.concatenate([wq, wk, wv], axis=1))    # (D, 3D)
        wo_l.append(wo)
        w1_l.append(w1)
        w2_l.append(w2)

        misc = jnp.zeros((8, LANES), jnp.float32)
        misc = misc.at[0, :3 * d].set(jnp.concatenate([bq, bk, bv]))
        misc = misc.at[1, :4 * d].set(b1)
        misc = misc.at[2, :d].set(bo)
        misc = misc.at[3, :d].set(b2)
        misc = misc.at[4, :d].set(ln1a)
        misc = misc.at[5, :d].set(ln1b)
        misc = misc.at[6, :d].set(ln2a)
        misc = misc.at[7, :d].set(ln2b)
        misc_l.append(misc)

    dense_w, dense_b = rnd((d, d)), rnd((d,))
    out_w, out_b = rnd((d, NUM_LABELS)), rnd((NUM_LABELS,))
    out_w_pad = jnp.zeros((d, LANES), jnp.float32).at[:, :NUM_LABELS].set(out_w)

    head_misc = jnp.zeros((4, LANES), jnp.float32)
    head_misc = head_misc.at[0, :d].set(1.0)                    # final LN weight
    # row 1 (final LN bias) stays zero
    head_misc = head_misc.at[2, :d].set(dense_b)
    head_misc = head_misc.at[3, :NUM_LABELS].set(out_b)

    return dict(
        tok_emb=tok_emb, pos_emb=pos_emb,
        wqkv=jnp.stack(wqkv_l),                                 # (L, D, 3D) f32
        wo=jnp.stack(wo_l),                                     # (L, D, D)  f32
        w1=jnp.stack(w1_l),                                     # (L, D, 4D) f32
        w2=jnp.stack(w2_l),                                     # (L, 4D, D) f32
        misc=jnp.stack(misc_l),                                 # (L, 8, LANES) f32
        dense_w=dense_w,                                        # (D, D)
        out_w=out_w_pad,                                        # (D, LANES)
        head_misc=head_misc,                                    # (4, LANES)
    )


if __name__ == "__main__":
    key = jax.random.PRNGKey(0)
    k_param, k_ids = jax.random.split(key)
    params = init_params(k_param)

    input_ids = jax.random.randint(k_ids, (B, S), 0, VOCAB, dtype=jnp.int32)
    input_mask = jnp.ones((B, 1, S), dtype=jnp.int32)  # broadcast over heads/queries

    start_logits, end_logits = transformer_mrc_forward(params, input_ids, input_mask)
    jax.block_until_ready((start_logits, end_logits))
    assert start_logits.shape == (B, S) and end_logits.shape == (B, S)
    assert bool(jnp.all(jnp.isfinite(start_logits))) and bool(jnp.all(jnp.isfinite(end_logits)))
    print("KERNEL_OK")
</pallas_src>

<mosaic_0001>
module attributes {stable_mosaic.version = 11 : i64} {
  func.func @fused_mrc_kernel(%arg0: memref<16x32xf32, #tpu.memory_space<vmem>>, %arg1: memref<16x16xi32, #tpu.memory_space<vmem>>, %arg2: memref<2x32x96xf32, #tpu.memory_space<vmem>>, %arg3: memref<2x32x32xf32, #tpu.memory_space<vmem>>, %arg4: memref<2x32x128xf32, #tpu.memory_space<vmem>>, %arg5: memref<2x128x32xf32, #tpu.memory_space<vmem>>, %arg6: memref<2x8x128xf32, #tpu.memory_space<vmem>>, %arg7: memref<32x32xf32, #tpu.memory_space<vmem>>, %arg8: memref<32x128xf32, #tpu.memory_space<vmem>>, %arg9: memref<4x128xf32, #tpu.memory_space<vmem>>, %arg10: memref<16x128xf32, #tpu.memory_space<vmem>>) attributes {dimension_semantics = [], scalar_prefetch = 0 : i64, scratch_operands = 0 : i64, tpu.core_type = #tpu.core_type<tc>} {
    %c0 = arith.constant 0 : index
    %c0_0 = arith.constant 0 : index
    %0 = vector.load %arg0[%c0, %c0_0] : memref<16x32xf32, #tpu.memory_space<vmem>>, vector<16x32xf32>
    %c0_1 = arith.constant 0 : index
    %c0_2 = arith.constant 0 : index
    %1 = vector.load %arg1[%c0_1, %c0_2] : memref<16x16xi32, #tpu.memory_space<vmem>>, vector<16x16xi32>
    %c0_3 = arith.constant 0 : index
    %c0_4 = arith.constant 0 : index
    %c0_5 = arith.constant 0 : index
    %2 = vector.load %arg2[%c0_3, %c0_4, %c0_5] : memref<2x32x96xf32, #tpu.memory_space<vmem>>, vector<1x32x96xf32>
    %3 = vector.shape_cast %2 : vector<1x32x96xf32> to vector<32x96xf32>
    %c0_6 = arith.constant 0 : index
    %c0_7 = arith.constant 0 : index
    %c0_8 = arith.constant 0 : index
    %4 = vector.load %arg3[%c0_6, %c0_7, %c0_8] : memref<2x32x32xf32, #tpu.memory_space<vmem>>, vector<1x32x32xf32>
    %5 = vector.shape_cast %4 : vector<1x32x32xf32> to vector<32x32xf32>
    %c0_9 = arith.constant 0 : index
    %c0_10 = arith.constant 0 : index
    %c0_11 = arith.constant 0 : index
    %6 = vector.load %arg4[%c0_9, %c0_10, %c0_11] : memref<2x32x128xf32, #tpu.memory_space<vmem>>, vector<1x32x128xf32>
    %7 = vector.shape_cast %6 : vector<1x32x128xf32> to vector<32x128xf32>
    %c0_12 = arith.constant 0 : index
    %c0_13 = arith.constant 0 : index
    %c0_14 = arith.constant 0 : index
    %8 = vector.load %arg5[%c0_12, %c0_13, %c0_14] : memref<2x128x32xf32, #tpu.memory_space<vmem>>, vector<1x128x32xf32>
    %9 = vector.shape_cast %8 : vector<1x128x32xf32> to vector<128x32xf32>
    %c0_15 = arith.constant 0 : index
    %c0_16 = arith.constant 0 : index
    %c0_17 = arith.constant 0 : index
    %10 = vector.load %arg6[%c0_15, %c0_16, %c0_17] : memref<2x8x128xf32, #tpu.memory_space<vmem>>, vector<1x8x128xf32>
    %11 = vector.shape_cast %10 : vector<1x8x128xf32> to vector<8x128xf32>
    %12 = vector.extract_strided_slice %11 {offsets = [0, 0], sizes = [1, 96], strides = [1, 1]} : vector<8x128xf32> to vector<1x96xf32>
    %13 = vector.extract_strided_slice %11 {offsets = [1, 0], sizes = [1, 128], strides = [1, 1]} : vector<8x128xf32> to vector<1x128xf32>
    %14 = vector.extract_strided_slice %11 {offsets = [2, 0], sizes = [1, 32], strides = [1, 1]} : vector<8x128xf32> to vector<1x32xf32>
    %15 = vector.extract_strided_slice %11 {offsets = [3, 0], sizes = [1, 32], strides = [1, 1]} : vector<8x128xf32> to vector<1x32xf32>
    %16 = vector.extract_strided_slice %11 {offsets = [4, 0], sizes = [1, 32], strides = [1, 1]} : vector<8x128xf32> to vector<1x32xf32>
    %17 = vector.extract_strided_slice %11 {offsets = [5, 0], sizes = [1, 32], strides = [1, 1]} : vector<8x128xf32> to vector<1x32xf32>
    %18 = vector.extract_strided_slice %11 {offsets = [6, 0], sizes = [1, 32], strides = [1, 1]} : vector<8x128xf32> to vector<1x32xf32>
    %19 = vector.extract_strided_slice %11 {offsets = [7, 0], sizes = [1, 32], strides = [1, 1]} : vector<8x128xf32> to vector<1x32xf32>
    %cst = arith.constant dense<0.000000e+00> : vector<16xf32>
    %20 = vector.multi_reduction <add>, %0, %cst [1] : vector<16x32xf32> to vector<16xf32>
    %21 = vector.shape_cast %20 : vector<16xf32> to vector<16x1xf32>
    %cst_18 = arith.constant 3.200000e+01 : f32
    %22 = vector.broadcast %cst_18 : f32 to vector<16x1xf32>
    %23 = arith.divf %21, %22 : vector<16x1xf32>
    %24 = vector.broadcast %23 : vector<16x1xf32> to vector<16x32xf32>
    %25 = arith.subf %0, %24 : vector<16x32xf32>
    %26 = arith.mulf %25, %25 : vector<16x32xf32>
    %cst_19 = arith.constant dense<0.000000e+00> : vector<16xf32>
    %27 = vector.multi_reduction <add>, %26, %cst_19 [1] : vector<16x32xf32> to vector<16xf32>
    %28 = vector.shape_cast %27 : vector<16xf32> to vector<16x1xf32>
    %cst_20 = arith.constant 3.100000e+01 : f32
    %29 = vector.broadcast %cst_20 : f32 to vector<16x1xf32>
    %30 = arith.divf %28, %29 : vector<16x1xf32>
    %31 = math.sqrt %30 : vector<16x1xf32>
    %32 = vector.broadcast %16 : vector<1x32xf32> to vector<16x32xf32>
    %33 = arith.mulf %32, %25 : vector<16x32xf32>
    %cst_21 = arith.constant 9.99999997E-7 : f32
    %34 = vector.broadcast %cst_21 : f32 to vector<16x1xf32>
    %35 = arith.addf %31, %34 : vector<16x1xf32>
    %36 = vector.broadcast %35 : vector<16x1xf32> to vector<16x32xf32>
    %37 = arith.divf %33, %36 : vector<16x32xf32>
    %38 = vector.broadcast %17 : vector<1x32xf32> to vector<16x32xf32>
    %39 = arith.addf %37, %38 : vector<16x32xf32>
    %cst_22 = arith.constant dense<0.000000e+00> : vector<16x96xf32>
    %40 = tpu.matmul %39, %3, %cst_22 {dimension_numbers = #tpu.dot_dimension_numbers<[1], [0], [0], [1], [0, 0, 1, 1], [], []>} : vector<16x32xf32>, vector<32x96xf32>, vector<16x96xf32> -> vector<16x96xf32>
    %41 = vector.broadcast %12 : vector<1x96xf32> to vector<16x96xf32>
    %42 = arith.addf %40, %41 : vector<16x96xf32>
    %cst_23 = arith.constant 0.000000e+00 : f32
    %43 = vector.broadcast %cst_23 : f32 to vector<16x32xf32>
    %44 = vector.extract_strided_slice %42 {offsets = [0, 0], sizes = [16, 8], strides = [1, 1]} : vector<16x96xf32> to vector<16x8xf32>
    %45 = vector.extract_strided_slice %42 {offsets = [0, 32], sizes = [16, 8], strides = [1, 1]} : vector<16x96xf32> to vector<16x8xf32>
    %46 = vector.extract_strided_slice %42 {offsets = [0, 64], sizes = [16, 8], strides = [1, 1]} : vector<16x96xf32> to vector<16x8xf32>
    %cst_24 = arith.constant dense<0.000000e+00> : vector<16x16xf32>
    %47 = tpu.matmul %44, %45, %cst_24 {dimension_numbers = #tpu.dot_dimension_numbers<[1], [1], [0], [0], [0, 0, 1, 0], [], []>} : vector<16x8xf32>, vector<16x8xf32>, vector<16x16xf32> -> vector<16x16xf32>
    %cst_25 = arith.constant 0.353553385 : f32
    %48 = vector.broadcast %cst_25 : f32 to vector<16x16xf32>
    %49 = arith.mulf %47, %48 : vector<16x16xf32>
    %c0_i32 = arith.constant 0 : i32
    %50 = vector.broadcast %c0_i32 : i32 to vector<16x16xi32>
    %51 = arith.cmpi ne, %1, %50 : vector<16x16xi32>
    %cst_26 = arith.constant -1.000000e+20 : f32
    %52 = vector.broadcast %cst_26 : f32 to vector<16x16xf32>
    %53 = arith.select %51, %49, %52 : vector<16x16xi1>, vector<16x16xf32>
    %cst_27 = arith.constant dense<0xFF800000> : vector<16xf32>
    %54 = vector.multi_reduction <maximumf>, %53, %cst_27 [1] : vector<16x16xf32> to vector<16xf32>
    %55 = vector.shape_cast %54 : vector<16xf32> to vector<16x1xf32>
    %56 = vector.broadcast %55 : vector<16x1xf32> to vector<16x16xf32>
    %57 = arith.subf %53, %56 : vector<16x16xf32>
    %58 = math.exp %57 : vector<16x16xf32>
    %cst_28 = arith.constant dense<0.000000e+00> : vector<16xf32>
    %59 = vector.multi_reduction <add>, %58, %cst_28 [1] : vector<16x16xf32> to vector<16xf32>
    %60 = vector.shape_cast %59 : vector<16xf32> to vector<16x1xf32>
    %61 = vector.broadcast %60 : vector<16x1xf32> to vector<16x16xf32>
    %62 = arith.divf %58, %61 : vector<16x16xf32>
    %cst_29 = arith.constant dense<0.000000e+00> : vector<16x8xf32>
    %63 = tpu.matmul %62, %46, %cst_29 {dimension_numbers = #tpu.dot_dimension_numbers<[1], [0], [0], [1], [0, 0, 1, 1], [], []>} : vector<16x16xf32>, vector<16x8xf32>, vector<16x8xf32> -> vector<16x8xf32>
    %64 = vector.extract_strided_slice %5 {offsets = [0, 0], sizes = [8, 32], strides = [1, 1]} : vector<32x32xf32> to vector<8x32xf32>
    %cst_30 = arith.constant dense<0.000000e+00> : vector<16x32xf32>
    %65 = tpu.matmul %63, %64, %cst_30 {dimension_numbers = #tpu.dot_dimension_numbers<[1], [0], [0], [1], [0, 0, 1, 1], [], []>} : vector<16x8xf32>, vector<8x32xf32>, vector<16x32xf32> -> vector<16x32xf32>
    %66 = arith.addf %43, %65 : vector<16x32xf32>
    %67 = vector.extract_strided_slice %42 {offsets = [0, 8], sizes = [16, 8], strides = [1, 1]} : vector<16x96xf32> to vector<16x8xf32>
    %68 = vector.extract_strided_slice %42 {offsets = [0, 40], sizes = [16, 8], strides = [1, 1]} : vector<16x96xf32> to vector<16x8xf32>
    %69 = vector.extract_strided_slice %42 {offsets = [0, 72], sizes = [16, 8], strides = [1, 1]} : vector<16x96xf32> to vector<16x8xf32>
    %cst_31 = arith.constant dense<0.000000e+00> : vector<16x16xf32>
    %70 = tpu.matmul %67, %68, %cst_31 {dimension_numbers = #tpu.dot_dimension_numbers<[1], [1], [0], [0], [0, 0, 1, 0], [], []>} : vector<16x8xf32>, vector<16x8xf32>, vector<16x16xf32> -> vector<16x16xf32>
    %cst_32 = arith.constant 0.353553385 : f32
    %71 = vector.broadcast %cst_32 : f32 to vector<16x16xf32>
    %72 = arith.mulf %70, %71 : vector<16x16xf32>
    %c0_i32_33 = arith.constant 0 : i32
    %73 = vector.broadcast %c0_i32_33 : i32 to vector<16x16xi32>
    %74 = arith.cmpi ne, %1, %73 : vector<16x16xi32>
    %cst_34 = arith.constant -1.000000e+20 : f32
    %75 = vector.broadcast %cst_34 : f32 to vector<16x16xf32>
    %76 = arith.select %74, %72, %75 : vector<16x16xi1>, vector<16x16xf32>
    %cst_35 = arith.constant dense<0xFF800000> : vector<16xf32>
    %77 = vector.multi_reduction <maximumf>, %76, %cst_35 [1] : vector<16x16xf32> to vector<16xf32>
    %78 = vector.shape_cast %77 : vector<16xf32> to vector<16x1xf32>
    %79 = vector.broadcast %78 : vector<16x1xf32> to vector<16x16xf32>
    %80 = arith.subf %76, %79 : vector<16x16xf32>
    %81 = math.exp %80 : vector<16x16xf32>
    %cst_36 = arith.constant dense<0.000000e+00> : vector<16xf32>
    %82 = vector.multi_reduction <add>, %81, %cst_36 [1] : vector<16x16xf32> to vector<16xf32>
    %83 = vector.shape_cast %82 : vector<16xf32> to vector<16x1xf32>
    %84 = vector.broadcast %83 : vector<16x1xf32> to vector<16x16xf32>
    %85 = arith.divf %81, %84 : vector<16x16xf32>
    %cst_37 = arith.constant dense<0.000000e+00> : vector<16x8xf32>
    %86 = tpu.matmul %85, %69, %cst_37 {dimension_numbers = #tpu.dot_dimension_numbers<[1], [0], [0], [1], [0, 0, 1, 1], [], []>} : vector<16x16xf32>, vector<16x8xf32>, vector<16x8xf32> -> vector<16x8xf32>
    %87 = vector.extract_strided_slice %5 {offsets = [8, 0], sizes = [8, 32], strides = [1, 1]} : vector<32x32xf32> to vector<8x32xf32>
    %cst_38 = arith.constant dense<0.000000e+00> : vector<16x32xf32>
    %88 = tpu.matmul %86, %87, %cst_38 {dimension_numbers = #tpu.dot_dimension_numbers<[1], [0], [0], [1], [0, 0, 1, 1], [], []>} : vector<16x8xf32>, vector<8x32xf32>, vector<16x32xf32> -> vector<16x32xf32>
    %89 = arith.addf %66, %88 : vector<16x32xf32>
    %90 = vector.extract_strided_slice %42 {offsets = [0, 16], sizes = [16, 8], strides = [1, 1]} : vector<16x96xf32> to vector<16x8xf32>
    %91 = vector.extract_strided_slice %42 {offsets = [0, 48], sizes = [16, 8], strides = [1, 1]} : vector<16x96xf32> to vector<16x8xf32>
    %92 = vector.extract_strided_slice %42 {offsets = [0, 80], sizes = [16, 8], strides = [1, 1]} : vector<16x96xf32> to vector<16x8xf32>
    %cst_39 = arith.constant dense<0.000000e+00> : vector<16x16xf32>
    %93 = tpu.matmul %90, %91, %cst_39 {dimension_numbers = #tpu.dot_dimension_numbers<[1], [1], [0], [0], [0, 0, 1, 0], [], []>} : vector<16x8xf32>, vector<16x8xf32>, vector<16x16xf32> -> vector<16x16xf32>
    %cst_40 = arith.constant 0.353553385 : f32
    %94 = vector.broadcast %cst_40 : f32 to vector<16x16xf32>
    %95 = arith.mulf %93, %94 : vector<16x16xf32>
    %c0_i32_41 = arith.constant 0 : i32
    %96 = vector.broadcast %c0_i32_41 : i32 to vector<16x16xi32>
    %97 = arith.cmpi ne, %1, %96 : vector<16x16xi32>
    %cst_42 = arith.constant -1.000000e+20 : f32
    %98 = vector.broadcast %cst_42 : f32 to vector<16x16xf32>
    %99 = arith.select %97, %95, %98 : vector<16x16xi1>, vector<16x16xf32>
    %cst_43 = arith.constant dense<0xFF800000> : vector<16xf32>
    %100 = vector.multi_reduction <maximumf>, %99, %cst_43 [1] : vector<16x16xf32> to vector<16xf32>
    %101 = vector.shape_cast %100 : vector<16xf32> to vector<16x1xf32>
    %102 = vector.broadcast %101 : vector<16x1xf32> to vector<16x16xf32>
    %103 = arith.subf %99, %102 : vector<16x16xf32>
    %104 = math.exp %103 : vector<16x16xf32>
    %cst_44 = arith.constant dense<0.000000e+00> : vector<16xf32>
    %105 = vector.multi_reduction <add>, %104, %cst_44 [1] : vector<16x16xf32> to vector<16xf32>
    %106 = vector.shape_cast %105 : vector<16xf32> to vector<16x1xf32>
    %107 = vector.broadcast %106 : vector<16x1xf32> to vector<16x16xf32>
    %108 = arith.divf %104, %107 : vector<16x16xf32>
    %cst_45 = arith.constant dense<0.000000e+00> : vector<16x8xf32>
    %109 = tpu.matmul %108, %92, %cst_45 {dimension_numbers = #tpu.dot_dimension_numbers<[1], [0], [0], [1], [0, 0, 1, 1], [], []>} : vector<16x16xf32>, vector<16x8xf32>, vector<16x8xf32> -> vector<16x8xf32>
    %110 = vector.extract_strided_slice %5 {offsets = [16, 0], sizes = [8, 32], strides = [1, 1]} : vector<32x32xf32> to vector<8x32xf32>
    %cst_46 = arith.constant dense<0.000000e+00> : vector<16x32xf32>
    %111 = tpu.matmul %109, %110, %cst_46 {dimension_numbers = #tpu.dot_dimension_numbers<[1], [0], [0], [1], [0, 0, 1, 1], [], []>} : vector<16x8xf32>, vector<8x32xf32>, vector<16x32xf32> -> vector<16x32xf32>
    %112 = arith.addf %89, %111 : vector<16x32xf32>
    %113 = vector.extract_strided_slice %42 {offsets = [0, 24], sizes = [16, 8], strides = [1, 1]} : vector<16x96xf32> to vector<16x8xf32>
    %114 = vector.extract_strided_slice %42 {offsets = [0, 56], sizes = [16, 8], strides = [1, 1]} : vector<16x96xf32> to vector<16x8xf32>
    %115 = vector.extract_strided_slice %42 {offsets = [0, 88], sizes = [16, 8], strides = [1, 1]} : vector<16x96xf32> to vector<16x8xf32>
    %cst_47 = arith.constant dense<0.000000e+00> : vector<16x16xf32>
    %116 = tpu.matmul %113, %114, %cst_47 {dimension_numbers = #tpu.dot_dimension_numbers<[1], [1], [0], [0], [0, 0, 1, 0], [], []>} : vector<16x8xf32>, vector<16x8xf32>, vector<16x16xf32> -> vector<16x16xf32>
    %cst_48 = arith.constant 0.353553385 : f32
    %117 = vector.broadcast %cst_48 : f32 to vector<16x16xf32>
    %118 = arith.mulf %116, %117 : vector<16x16xf32>
    %c0_i32_49 = arith.constant 0 : i32
    %119 = vector.broadcast %c0_i32_49 : i32 to vector<16x16xi32>
    %120 = arith.cmpi ne, %1, %119 : vector<16x16xi32>
    %cst_50 = arith.constant -1.000000e+20 : f32
    %121 = vector.broadcast %cst_50 : f32 to vector<16x16xf32>
    %122 = arith.select %120, %118, %121 : vector<16x16xi1>, vector<16x16xf32>
    %cst_51 = arith.constant dense<0xFF800000> : vector<16xf32>
    %123 = vector.multi_reduction <maximumf>, %122, %cst_51 [1] : vector<16x16xf32> to vector<16xf32>
    %124 = vector.shape_cast %123 : vector<16xf32> to vector<16x1xf32>
    %125 = vector.broadcast %124 : vector<16x1xf32> to vector<16x16xf32>
    %126 = arith.subf %122, %125 : vector<16x16xf32>
    %127 = math.exp %126 : vector<16x16xf32>
    %cst_52 = arith.constant dense<0.000000e+00> : vector<16xf32>
    %128 = vector.multi_reduction <add>, %127, %cst_52 [1] : vector<16x16xf32> to vector<16xf32>
    %129 = vector.shape_cast %128 : vector<16xf32> to vector<16x1xf32>
    %130 = vector.broadcast %129 : vector<16x1xf32> to vector<16x16xf32>
    %131 = arith.divf %127, %130 : vector<16x16xf32>
    %cst_53 = arith.constant dense<0.000000e+00> : vector<16x8xf32>
    %132 = tpu.matmul %131, %115, %cst_53 {dimension_numbers = #tpu.dot_dimension_numbers<[1], [0], [0], [1], [0, 0, 1, 1], [], []>} : vector<16x16xf32>, vector<16x8xf32>, vector<16x8xf32> -> vector<16x8xf32>
    %133 = vector.extract_strided_slice %5 {offsets = [24, 0], sizes = [8, 32], strides = [1, 1]} : vector<32x32xf32> to vector<8x32xf32>
    %cst_54 = arith.constant dense<0.000000e+00> : vector<16x32xf32>
    %134 = tpu.matmul %132, %133, %cst_54 {dimension_numbers = #tpu.dot_dimension_numbers<[1], [0], [0], [1], [0, 0, 1, 1], [], []>} : vector<16x8xf32>, vector<8x32xf32>, vector<16x32xf32> -> vector<16x32xf32>
    %135 = arith.addf %112, %134 : vector<16x32xf32>
    %136 = arith.addf %0, %135 : vector<16x32xf32>
    %137 = vector.broadcast %14 : vector<1x32xf32> to vector<16x32xf32>
    %138 = arith.addf %136, %137 : vector<16x32xf32>
    %cst_55 = arith.constant dense<0.000000e+00> : vector<16xf32>
    %139 = vector.multi_reduction <add>, %138, %cst_55 [1] : vector<16x32xf32> to vector<16xf32>
    %140 = vector.shape_cast %139 : vector<16xf32> to vector<16x1xf32>
    %cst_56 = arith.constant 3.200000e+01 : f32
    %141 = vector.broadcast %cst_56 : f32 to vector<16x1xf32>
    %142 = arith.divf %140, %141 : vector<16x1xf32>
    %143 = vector.broadcast %142 : vector<16x1xf32> to vector<16x32xf32>
    %144 = arith.subf %138, %143 : vector<16x32xf32>
    %145 = arith.mulf %144, %144 : vector<16x32xf32>
    %cst_57 = arith.constant dense<0.000000e+00> : vector<16xf32>
    %146 = vector.multi_reduction <add>, %145, %cst_57 [1] : vector<16x32xf32> to vector<16xf32>
    %147 = vector.shape_cast %146 : vector<16xf32> to vector<16x1xf32>
    %cst_58 = arith.constant 3.100000e+01 : f32
    %148 = vector.broadcast %cst_58 : f32 to vector<16x1xf32>
    %149 = arith.divf %147, %148 : vector<16x1xf32>
    %150 = math.sqrt %149 : vector<16x1xf32>
    %151 = vector.broadcast %18 : vector<1x32xf32> to vector<16x32xf32>
    %152 = arith.mulf %151, %144 : vector<16x32xf32>
    %cst_59 = arith.constant 9.99999997E-7 : f32
    %153 = vector.broadcast %cst_59 : f32 to vector<16x1xf32>
    %154 = arith.addf %150, %153 : vector<16x1xf32>
    %155 = vector.broadcast %154 : vector<16x1xf32> to vector<16x32xf32>
    %156 = arith.divf %152, %155 : vector<16x32xf32>
    %157 = vector.broadcast %19 : vector<1x32xf32> to vector<16x32xf32>
    %158 = arith.addf %156, %157 : vector<16x32xf32>
    %cst_60 = arith.constant dense<0.000000e+00> : vector<16x128xf32>
    %159 = tpu.matmul %158, %7, %cst_60 {dimension_numbers = #tpu.dot_dimension_numbers<[1], [0], [0], [1], [0, 0, 1, 1], [], []>} : vector<16x32xf32>, vector<32x128xf32>, vector<16x128xf32> -> vector<16x128xf32>
    %160 = vector.broadcast %13 : vector<1x128xf32> to vector<16x128xf32>
    %161 = arith.addf %159, %160 : vector<16x128xf32>
    %cst_61 = arith.constant 0.000000e+00 : f32
    %162 = vector.broadcast %cst_61 : f32 to vector<16x128xf32>
    %163 = arith.maximumf %161, %162 : vector<16x128xf32>
    %cst_62 = arith.constant dense<0.000000e+00> : vector<16x32xf32>
    %164 = tpu.matmul %163, %9, %cst_62 {dimension_numbers = #tpu.dot_dimension_numbers<[1], [0], [0], [1], [0, 0, 1, 1], [], []>} : vector<16x128xf32>, vector<128x32xf32>, vector<16x32xf32> -> vector<16x32xf32>
    %165 = vector.broadcast %15 : vector<1x32xf32> to vector<16x32xf32>
    %166 = arith.addf %164, %165 : vector<16x32xf32>
    %167 = arith.addf %138, %166 : vector<16x32xf32>
    %c1 = arith.constant 1 : index
    %c0_63 = arith.constant 0 : index
    %c0_64 = arith.constant 0 : index
    %168 = vector.load %arg2[%c1, %c0_63, %c0_64] : memref<2x32x96xf32, #tpu.memory_space<vmem>>, vector<1x32x96xf32>
    %169 = vector.shape_cast %168 : vector<1x32x96xf32> to vector<32x96xf32>
    %c1_65 = arith.constant 1 : index
    %c0_66 = arith.constant 0 : index
    %c0_67 = arith.constant 0 : index
    %170 = vector.load %arg3[%c1_65, %c0_66, %c0_67] : memref<2x32x32xf32, #tpu.memory_space<vmem>>, vector<1x32x32xf32>
    %171 = vector.shape_cast %170 : vector<1x32x32xf32> to vector<32x32xf32>
    %c1_68 = arith.constant 1 : index
    %c0_69 = arith.constant 0 : index
    %c0_70 = arith.constant 0 : index
    %172 = vector.load %arg4[%c1_68, %c0_69, %c0_70] : memref<2x32x128xf32, #tpu.memory_space<vmem>>, vector<1x32x128xf32>
    %173 = vector.shape_cast %172 : vector<1x32x128xf32> to vector<32x128xf32>
    %c1_71 = arith.constant 1 : index
    %c0_72 = arith.constant 0 : index
    %c0_73 = arith.constant 0 : index
    %174 = vector.load %arg5[%c1_71, %c0_72, %c0_73] : memref<2x128x32xf32, #tpu.memory_space<vmem>>, vector<1x128x32xf32>
    %175 = vector.shape_cast %174 : vector<1x128x32xf32> to vector<128x32xf32>
    %c1_74 = arith.constant 1 : index
    %c0_75 = arith.constant 0 : index
    %c0_76 = arith.constant 0 : index
    %176 = vector.load %arg6[%c1_74, %c0_75, %c0_76] : memref<2x8x128xf32, #tpu.memory_space<vmem>>, vector<1x8x128xf32>
    %177 = vector.shape_cast %176 : vector<1x8x128xf32> to vector<8x128xf32>
    %178 = vector.extract_strided_slice %177 {offsets = [0, 0], sizes = [1, 96], strides = [1, 1]} : vector<8x128xf32> to vector<1x96xf32>
    %179 = vector.extract_strided_slice %177 {offsets = [1, 0], sizes = [1, 128], strides = [1, 1]} : vector<8x128xf32> to vector<1x128xf32>
    %180 = vector.extract_strided_slice %177 {offsets = [2, 0], sizes = [1, 32], strides = [1, 1]} : vector<8x128xf32> to vector<1x32xf32>
    %181 = vector.extract_strided_slice %177 {offsets = [3, 0], sizes = [1, 32], strides = [1, 1]} : vector<8x128xf32> to vector<1x32xf32>
    %182 = vector.extract_strided_slice %177 {offsets = [4, 0], sizes = [1, 32], strides = [1, 1]} : vector<8x128xf32> to vector<1x32xf32>
    %183 = vector.extract_strided_slice %177 {offsets = [5, 0], sizes = [1, 32], strides = [1, 1]} : vector<8x128xf32> to vector<1x32xf32>
    %184 = vector.extract_strided_slice %177 {offsets = [6, 0], sizes = [1, 32], strides = [1, 1]} : vector<8x128xf32> to vector<1x32xf32>
    %185 = vector.extract_strided_slice %177 {offsets = [7, 0], sizes = [1, 32], strides = [1, 1]} : vector<8x128xf32> to vector<1x32xf32>
    %cst_77 = arith.constant dense<0.000000e+00> : vector<16xf32>
    %186 = vector.multi_reduction <add>, %167, %cst_77 [1] : vector<16x32xf32> to vector<16xf32>
    %187 = vector.shape_cast %186 : vector<16xf32> to vector<16x1xf32>
    %cst_78 = arith.constant 3.200000e+01 : f32
    %188 = vector.broadcast %cst_78 : f32 to vector<16x1xf32>
    %189 = arith.divf %187, %188 : vector<16x1xf32>
    %190 = vector.broadcast %189 : vector<16x1xf32> to vector<16x32xf32>
    %191 = arith.subf %167, %190 : vector<16x32xf32>
    %192 = arith.mulf %191, %191 : vector<16x32xf32>
    %cst_79 = arith.constant dense<0.000000e+00> : vector<16xf32>
    %193 = vector.multi_reduction <add>, %192, %cst_79 [1] : vector<16x32xf32> to vector<16xf32>
    %194 = vector.shape_cast %193 : vector<16xf32> to vector<16x1xf32>
    %cst_80 = arith.constant 3.100000e+01 : f32
    %195 = vector.broadcast %cst_80 : f32 to vector<16x1xf32>
    %196 = arith.divf %194, %195 : vector<16x1xf32>
    %197 = math.sqrt %196 : vector<16x1xf32>
    %198 = vector.broadcast %182 : vector<1x32xf32> to vector<16x32xf32>
    %199 = arith.mulf %198, %191 : vector<16x32xf32>
    %cst_81 = arith.constant 9.99999997E-7 : f32
    %200 = vector.broadcast %cst_81 : f32 to vector<16x1xf32>
    %201 = arith.addf %197, %200 : vector<16x1xf32>
    %202 = vector.broadcast %201 : vector<16x1xf32> to vector<16x32xf32>
    %203 = arith.divf %199, %202 : vector<16x32xf32>
    %204 = vector.broadcast %183 : vector<1x32xf32> to vector<16x32xf32>
    %205 = arith.addf %203, %204 : vector<16x32xf32>
    %cst_82 = arith.constant dense<0.000000e+00> : vector<16x96xf32>
    %206 = tpu.matmul %205, %169, %cst_82 {dimension_numbers = #tpu.dot_dimension_numbers<[1], [0], [0], [1], [0, 0, 1, 1], [], []>} : vector<16x32xf32>, vector<32x96xf32>, vector<16x96xf32> -> vector<16x96xf32>
    %207 = vector.broadcast %178 : vector<1x96xf32> to vector<16x96xf32>
    %208 = arith.addf %206, %207 : vector<16x96xf32>
    %cst_83 = arith.constant 0.000000e+00 : f32
    %209 = vector.broadcast %cst_83 : f32 to vector<16x32xf32>
    %210 = vector.extract_strided_slice %208 {offsets = [0, 0], sizes = [16, 8], strides = [1, 1]} : vector<16x96xf32> to vector<16x8xf32>
    %211 = vector.extract_strided_slice %208 {offsets = [0, 32], sizes = [16, 8], strides = [1, 1]} : vector<16x96xf32> to vector<16x8xf32>
    %212 = vector.extract_strided_slice %208 {offsets = [0, 64], sizes = [16, 8], strides = [1, 1]} : vector<16x96xf32> to vector<16x8xf32>
    %cst_84 = arith.constant dense<0.000000e+00> : vector<16x16xf32>
    %213 = tpu.matmul %210, %211, %cst_84 {dimension_numbers = #tpu.dot_dimension_numbers<[1], [1], [0], [0], [0, 0, 1, 0], [], []>} : vector<16x8xf32>, vector<16x8xf32>, vector<16x16xf32> -> vector<16x16xf32>
    %cst_85 = arith.constant 0.353553385 : f32
    %214 = vector.broadcast %cst_85 : f32 to vector<16x16xf32>
    %215 = arith.mulf %213, %214 : vector<16x16xf32>
    %c0_i32_86 = arith.constant 0 : i32
    %216 = vector.broadcast %c0_i32_86 : i32 to vector<16x16xi32>
    %217 = arith.cmpi ne, %1, %216 : vector<16x16xi32>
    %cst_87 = arith.constant -1.000000e+20 : f32
    %218 = vector.broadcast %cst_87 : f32 to vector<16x16xf32>
    %219 = arith.select %217, %215, %218 : vector<16x16xi1>, vector<16x16xf32>
    %cst_88 = arith.constant dense<0xFF800000> : vector<16xf32>
    %220 = vector.multi_reduction <maximumf>, %219, %cst_88 [1] : vector<16x16xf32> to vector<16xf32>
    %221 = vector.shape_cast %220 : vector<16xf32> to vector<16x1xf32>
    %222 = vector.broadcast %221 : vector<16x1xf32> to vector<16x16xf32>
    %223 = arith.subf %219, %222 : vector<16x16xf32>
    %224 = math.exp %223 : vector<16x16xf32>
    %cst_89 = arith.constant dense<0.000000e+00> : vector<16xf32>
    %225 = vector.multi_reduction <add>, %224, %cst_89 [1] : vector<16x16xf32> to vector<16xf32>
    %226 = vector.shape_cast %225 : vector<16xf32> to vector<16x1xf32>
    %227 = vector.broadcast %226 : vector<16x1xf32> to vector<16x16xf32>
    %228 = arith.divf %224, %227 : vector<16x16xf32>
    %cst_90 = arith.constant dense<0.000000e+00> : vector<16x8xf32>
    %229 = tpu.matmul %228, %212, %cst_90 {dimension_numbers = #tpu.dot_dimension_numbers<[1], [0], [0], [1], [0, 0, 1, 1], [], []>} : vector<16x16xf32>, vector<16x8xf32>, vector<16x8xf32> -> vector<16x8xf32>
    %230 = vector.extract_strided_slice %171 {offsets = [0, 0], sizes = [8, 32], strides = [1, 1]} : vector<32x32xf32> to vector<8x32xf32>
    %cst_91 = arith.constant dense<0.000000e+00> : vector<16x32xf32>
    %231 = tpu.matmul %229, %230, %cst_91 {dimension_numbers = #tpu.dot_dimension_numbers<[1], [0], [0], [1], [0, 0, 1, 1], [], []>} : vector<16x8xf32>, vector<8x32xf32>, vector<16x32xf32> -> vector<16x32xf32>
    %232 = arith.addf %209, %231 : vector<16x32xf32>
    %233 = vector.extract_strided_slice %208 {offsets = [0, 8], sizes = [16, 8], strides = [1, 1]} : vector<16x96xf32> to vector<16x8xf32>
    %234 = vector.extract_strided_slice %208 {offsets = [0, 40], sizes = [16, 8], strides = [1, 1]} : vector<16x96xf32> to vector<16x8xf32>
    %235 = vector.extract_strided_slice %208 {offsets = [0, 72], sizes = [16, 8], strides = [1, 1]} : vector<16x96xf32> to vector<16x8xf32>
    %cst_92 = arith.constant dense<0.000000e+00> : vector<16x16xf32>
    %236 = tpu.matmul %233, %234, %cst_92 {dimension_numbers = #tpu.dot_dimension_numbers<[1], [1], [0], [0], [0, 0, 1, 0], [], []>} : vector<16x8xf32>, vector<16x8xf32>, vector<16x16xf32> -> vector<16x16xf32>
    %cst_93 = arith.constant 0.353553385 : f32
    %237 = vector.broadcast %cst_93 : f32 to vector<16x16xf32>
    %238 = arith.mulf %236, %237 : vector<16x16xf32>
    %c0_i32_94 = arith.constant 0 : i32
    %239 = vector.broadcast %c0_i32_94 : i32 to vector<16x16xi32>
    %240 = arith.cmpi ne, %1, %239 : vector<16x16xi32>
    %cst_95 = arith.constant -1.000000e+20 : f32
    %241 = vector.broadcast %cst_95 : f32 to vector<16x16xf32>
    %242 = arith.select %240, %238, %241 : vector<16x16xi1>, vector<16x16xf32>
    %cst_96 = arith.constant dense<0xFF800000> : vector<16xf32>
    %243 = vector.multi_reduction <maximumf>, %242, %cst_96 [1] : vector<16x16xf32> to vector<16xf32>
    %244 = vector.shape_cast %243 : vector<16xf32> to vector<16x1xf32>
    %245 = vector.broadcast %244 : vector<16x1xf32> to vector<16x16xf32>
    %246 = arith.subf %242, %245 : vector<16x16xf32>
    %247 = math.exp %246 : vector<16x16xf32>
    %cst_97 = arith.constant dense<0.000000e+00> : vector<16xf32>
    %248 = vector.multi_reduction <add>, %247, %cst_97 [1] : vector<16x16xf32> to vector<16xf32>
    %249 = vector.shape_cast %248 : vector<16xf32> to vector<16x1xf32>
    %250 = vector.broadcast %249 : vector<16x1xf32> to vector<16x16xf32>
    %251 = arith.divf %247, %250 : vector<16x16xf32>
    %cst_98 = arith.constant dense<0.000000e+00> : vector<16x8xf32>
    %252 = tpu.matmul %251, %235, %cst_98 {dimension_numbers = #tpu.dot_dimension_numbers<[1], [0], [0], [1], [0, 0, 1, 1], [], []>} : vector<16x16xf32>, vector<16x8xf32>, vector<16x8xf32> -> vector<16x8xf32>
    %253 = vector.extract_strided_slice %171 {offsets = [8, 0], sizes = [8, 32], strides = [1, 1]} : vector<32x32xf32> to vector<8x32xf32>
    %cst_99 = arith.constant dense<0.000000e+00> : vector<16x32xf32>
    %254 = tpu.matmul %252, %253, %cst_99 {dimension_numbers = #tpu.dot_dimension_numbers<[1], [0], [0], [1], [0, 0, 1, 1], [], []>} : vector<16x8xf32>, vector<8x32xf32>, vector<16x32xf32> -> vector<16x32xf32>
    %255 = arith.addf %232, %254 : vector<16x32xf32>
    %256 = vector.extract_strided_slice %208 {offsets = [0, 16], sizes = [16, 8], strides = [1, 1]} : vector<16x96xf32> to vector<16x8xf32>
    %257 = vector.extract_strided_slice %208 {offsets = [0, 48], sizes = [16, 8], strides = [1, 1]} : vector<16x96xf32> to vector<16x8xf32>
    %258 = vector.extract_strided_slice %208 {offsets = [0, 80], sizes = [16, 8], strides = [1, 1]} : vector<16x96xf32> to vector<16x8xf32>
    %cst_100 = arith.constant dense<0.000000e+00> : vector<16x16xf32>
    %259 = tpu.matmul %256, %257, %cst_100 {dimension_numbers = #tpu.dot_dimension_numbers<[1], [1], [0], [0], [0, 0, 1, 0], [], []>} : vector<16x8xf32>, vector<16x8xf32>, vector<16x16xf32> -> vector<16x16xf32>
    %cst_101 = arith.constant 0.353553385 : f32
    %260 = vector.broadcast %cst_101 : f32 to vector<16x16xf32>
    %261 = arith.mulf %259, %260 : vector<16x16xf32>
    %c0_i32_102 = arith.constant 0 : i32
    %262 = vector.broadcast %c0_i32_102 : i32 to vector<16x16xi32>
    %263 = arith.cmpi ne, %1, %262 : vector<16x16xi32>
    %cst_103 = arith.constant -1.000000e+20 : f32
    %264 = vector.broadcast %cst_103 : f32 to vector<16x16xf32>
    %265 = arith.select %263, %261, %264 : vector<16x16xi1>, vector<16x16xf32>
    %cst_104 = arith.constant dense<0xFF800000> : vector<16xf32>
    %266 = vector.multi_reduction <maximumf>, %265, %cst_104 [1] : vector<16x16xf32> to vector<16xf32>
    %267 = vector.shape_cast %266 : vector<16xf32> to vector<16x1xf32>
    %268 = vector.broadcast %267 : vector<16x1xf32> to vector<16x16xf32>
    %269 = arith.subf %265, %268 : vector<16x16xf32>
    %270 = math.exp %269 : vector<16x16xf32>
    %cst_105 = arith.constant dense<0.000000e+00> : vector<16xf32>
    %271 = vector.multi_reduction <add>, %270, %cst_105 [1] : vector<16x16xf32> to vector<16xf32>
    %272 = vector.shape_cast %271 : vector<16xf32> to vector<16x1xf32>
    %273 = vector.broadcast %272 : vector<16x1xf32> to vector<16x16xf32>
    %274 = arith.divf %270, %273 : vector<16x16xf32>
    %cst_106 = arith.constant dense<0.000000e+00> : vector<16x8xf32>
    %275 = tpu.matmul %274, %258, %cst_106 {dimension_numbers = #tpu.dot_dimension_numbers<[1], [0], [0], [1], [0, 0, 1, 1], [], []>} : vector<16x16xf32>, vector<16x8xf32>, vector<16x8xf32> -> vector<16x8xf32>
    %276 = vector.extract_strided_slice %171 {offsets = [16, 0], sizes = [8, 32], strides = [1, 1]} : vector<32x32xf32> to vector<8x32xf32>
    %cst_107 = arith.constant dense<0.000000e+00> : vector<16x32xf32>
    %277 = tpu.matmul %275, %276, %cst_107 {dimension_numbers = #tpu.dot_dimension_numbers<[1], [0], [0], [1], [0, 0, 1, 1], [], []>} : vector<16x8xf32>, vector<8x32xf32>, vector<16x32xf32> -> vector<16x32xf32>
    %278 = arith.addf %255, %277 : vector<16x32xf32>
    %279 = vector.extract_strided_slice %208 {offsets = [0, 24], sizes = [16, 8], strides = [1, 1]} : vector<16x96xf32> to vector<16x8xf32>
    %280 = vector.extract_strided_slice %208 {offsets = [0, 56], sizes = [16, 8], strides = [1, 1]} : vector<16x96xf32> to vector<16x8xf32>
    %281 = vector.extract_strided_slice %208 {offsets = [0, 88], sizes = [16, 8], strides = [1, 1]} : vector<16x96xf32> to vector<16x8xf32>
    %cst_108 = arith.constant dense<0.000000e+00> : vector<16x16xf32>
    %282 = tpu.matmul %279, %280, %cst_108 {dimension_numbers = #tpu.dot_dimension_numbers<[1], [1], [0], [0], [0, 0, 1, 0], [], []>} : vector<16x8xf32>, vector<16x8xf32>, vector<16x16xf32> -> vector<16x16xf32>
    %cst_109 = arith.constant 0.353553385 : f32
    %283 = vector.broadcast %cst_109 : f32 to vector<16x16xf32>
    %284 = arith.mulf %282, %283 : vector<16x16xf32>
    %c0_i32_110 = arith.constant 0 : i32
    %285 = vector.broadcast %c0_i32_110 : i32 to vector<16x16xi32>
    %286 = arith.cmpi ne, %1, %285 : vector<16x16xi32>
    %cst_111 = arith.constant -1.000000e+20 : f32
    %287 = vector.broadcast %cst_111 : f32 to vector<16x16xf32>
    %288 = arith.select %286, %284, %287 : vector<16x16xi1>, vector<16x16xf32>
    %cst_112 = arith.constant dense<0xFF800000> : vector<16xf32>
    %289 = vector.multi_reduction <maximumf>, %288, %cst_112 [1] : vector<16x16xf32> to vector<16xf32>
    %290 = vector.shape_cast %289 : vector<16xf32> to vector<16x1xf32>
    %291 = vector.broadcast %290 : vector<16x1xf32> to vector<16x16xf32>
    %292 = arith.subf %288, %291 : vector<16x16xf32>
    %293 = math.exp %292 : vector<16x16xf32>
    %cst_113 = arith.constant dense<0.000000e+00> : vector<16xf32>
    %294 = vector.multi_reduction <add>, %293, %cst_113 [1] : vector<16x16xf32> to vector<16xf32>
    %295 = vector.shape_cast %294 : vector<16xf32> to vector<16x1xf32>
    %296 = vector.broadcast %295 : vector<16x1xf32> to vector<16x16xf32>
    %297 = arith.divf %293, %296 : vector<16x16xf32>
    %cst_114 = arith.constant dense<0.000000e+00> : vector<16x8xf32>
    %298 = tpu.matmul %297, %281, %cst_114 {dimension_numbers = #tpu.dot_dimension_numbers<[1], [0], [0], [1], [0, 0, 1, 1], [], []>} : vector<16x16xf32>, vector<16x8xf32>, vector<16x8xf32> -> vector<16x8xf32>
    %299 = vector.extract_strided_slice %171 {offsets = [24, 0], sizes = [8, 32], strides = [1, 1]} : vector<32x32xf32> to vector<8x32xf32>
    %cst_115 = arith.constant dense<0.000000e+00> : vector<16x32xf32>
    %300 = tpu.matmul %298, %299, %cst_115 {dimension_numbers = #tpu.dot_dimension_numbers<[1], [0], [0], [1], [0, 0, 1, 1], [], []>} : vector<16x8xf32>, vector<8x32xf32>, vector<16x32xf32> -> vector<16x32xf32>
    %301 = arith.addf %278, %300 : vector<16x32xf32>
    %302 = arith.addf %167, %301 : vector<16x32xf32>
    %303 = vector.broadcast %180 : vector<1x32xf32> to vector<16x32xf32>
    %304 = arith.addf %302, %303 : vector<16x32xf32>
    %cst_116 = arith.constant dense<0.000000e+00> : vector<16xf32>
    %305 = vector.multi_reduction <add>, %304, %cst_116 [1] : vector<16x32xf32> to vector<16xf32>
    %306 = vector.shape_cast %305 : vector<16xf32> to vector<16x1xf32>
    %cst_117 = arith.constant 3.200000e+01 : f32
    %307 = vector.broadcast %cst_117 : f32 to vector<16x1xf32>
    %308 = arith.divf %306, %307 : vector<16x1xf32>
    %309 = vector.broadcast %308 : vector<16x1xf32> to vector<16x32xf32>
    %310 = arith.subf %304, %309 : vector<16x32xf32>
    %311 = arith.mulf %310, %310 : vector<16x32xf32>
    %cst_118 = arith.constant dense<0.000000e+00> : vector<16xf32>
    %312 = vector.multi_reduction <add>, %311, %cst_118 [1] : vector<16x32xf32> to vector<16xf32>
    %313 = vector.shape_cast %312 : vector<16xf32> to vector<16x1xf32>
    %cst_119 = arith.constant 3.100000e+01 : f32
    %314 = vector.broadcast %cst_119 : f32 to vector<16x1xf32>
    %315 = arith.divf %313, %314 : vector<16x1xf32>
    %316 = math.sqrt %315 : vector<16x1xf32>
    %317 = vector.broadcast %184 : vector<1x32xf32> to vector<16x32xf32>
    %318 = arith.mulf %317, %310 : vector<16x32xf32>
    %cst_120 = arith.constant 9.99999997E-7 : f32
    %319 = vector.broadcast %cst_120 : f32 to vector<16x1xf32>
    %320 = arith.addf %316, %319 : vector<16x1xf32>
    %321 = vector.broadcast %320 : vector<16x1xf32> to vector<16x32xf32>
    %322 = arith.divf %318, %321 : vector<16x32xf32>
    %323 = vector.broadcast %185 : vector<1x32xf32> to vector<16x32xf32>
    %324 = arith.addf %322, %323 : vector<16x32xf32>
    %cst_121 = arith.constant dense<0.000000e+00> : vector<16x128xf32>
    %325 = tpu.matmul %324, %173, %cst_121 {dimension_numbers = #tpu.dot_dimension_numbers<[1], [0], [0], [1], [0, 0, 1, 1], [], []>} : vector<16x32xf32>, vector<32x128xf32>, vector<16x128xf32> -> vector<16x128xf32>
    %326 = vector.broadcast %179 : vector<1x128xf32> to vector<16x128xf32>
    %327 = arith.addf %325, %326 : vector<16x128xf32>
    %cst_122 = arith.constant 0.000000e+00 : f32
    %328 = vector.broadcast %cst_122 : f32 to vector<16x128xf32>
    %329 = arith.maximumf %327, %328 : vector<16x128xf32>
    %cst_123 = arith.constant dense<0.000000e+00> : vector<16x32xf32>
    %330 = tpu.matmul %329, %175, %cst_123 {dimension_numbers = #tpu.dot_dimension_numbers<[1], [0], [0], [1], [0, 0, 1, 1], [], []>} : vector<16x128xf32>, vector<128x32xf32>, vector<16x32xf32> -> vector<16x32xf32>
    %331 = vector.broadcast %181 : vector<1x32xf32> to vector<16x32xf32>
    %332 = arith.addf %330, %331 : vector<16x32xf32>
    %333 = arith.addf %304, %332 : vector<16x32xf32>
    %c0_124 = arith.constant 0 : index
    %c0_125 = arith.constant 0 : index
    %334 = vector.load %arg9[%c0_124, %c0_125] : memref<4x128xf32, #tpu.memory_space<vmem>>, vector<1x32xf32>
    %c1_126 = arith.constant 1 : index
    %c0_127 = arith.constant 0 : index
    %335 = vector.load %arg9[%c1_126, %c0_127] : memref<4x128xf32, #tpu.memory_space<vmem>>, vector<1x32xf32>
    %c2 = arith.constant 2 : index
    %c0_128 = arith.constant 0 : index
    %336 = vector.load %arg9[%c2, %c0_128] : memref<4x128xf32, #tpu.memory_space<vmem>>, vector<1x32xf32>
    %c3 = arith.constant 3 : index
    %c0_129 = arith.constant 0 : index
    %337 = vector.load %arg9[%c3, %c0_129] : memref<4x128xf32, #tpu.memory_space<vmem>>, vector<1x128xf32>
    %cst_130 = arith.constant dense<0.000000e+00> : vector<16xf32>
    %338 = vector.multi_reduction <add>, %333, %cst_130 [1] : vector<16x32xf32> to vector<16xf32>
    %339 = vector.shape_cast %338 : vector<16xf32> to vector<16x1xf32>
    %cst_131 = arith.constant 3.200000e+01 : f32
    %340 = vector.broadcast %cst_131 : f32 to vector<16x1xf32>
    %341 = arith.divf %339, %340 : vector<16x1xf32>
    %342 = vector.broadcast %341 : vector<16x1xf32> to vector<16x32xf32>
    %343 = arith.subf %333, %342 : vector<16x32xf32>
    %344 = arith.mulf %343, %343 : vector<16x32xf32>
    %cst_132 = arith.constant dense<0.000000e+00> : vector<16xf32>
    %345 = vector.multi_reduction <add>, %344, %cst_132 [1] : vector<16x32xf32> to vector<16xf32>
    %346 = vector.shape_cast %345 : vector<16xf32> to vector<16x1xf32>
    %cst_133 = arith.constant 3.200000e+01 : f32
    %347 = vector.broadcast %cst_133 : f32 to vector<16x1xf32>
    %348 = arith.divf %346, %347 : vector<16x1xf32>
    %cst_134 = arith.constant 9.99999974E-6 : f32
    %349 = vector.broadcast %cst_134 : f32 to vector<16x1xf32>
    %350 = arith.addf %348, %349 : vector<16x1xf32>
    %351 = math.rsqrt %350 : vector<16x1xf32>
    %352 = vector.broadcast %351 : vector<16x1xf32> to vector<16x32xf32>
    %353 = arith.mulf %343, %352 : vector<16x32xf32>
    %354 = vector.broadcast %334 : vector<1x32xf32> to vector<16x32xf32>
    %355 = arith.mulf %353, %354 : vector<16x32xf32>
    %356 = vector.broadcast %335 : vector<1x32xf32> to vector<16x32xf32>
    %357 = arith.addf %355, %356 : vector<16x32xf32>
    %c0_135 = arith.constant 0 : index
    %c0_136 = arith.constant 0 : index
    %358 = vector.load %arg7[%c0_135, %c0_136] : memref<32x32xf32, #tpu.memory_space<vmem>>, vector<32x32xf32>
    %cst_137 = arith.constant dense<0.000000e+00> : vector<16x32xf32>
    %359 = tpu.matmul %357, %358, %cst_137 {dimension_numbers = #tpu.dot_dimension_numbers<[1], [0], [0], [1], [0, 0, 1, 1], [], []>} : vector<16x32xf32>, vector<32x32xf32>, vector<16x32xf32> -> vector<16x32xf32>
    %360 = vector.broadcast %336 : vector<1x32xf32> to vector<16x32xf32>
    %361 = arith.addf %359, %360 : vector<16x32xf32>
    %cst_138 = arith.constant 5.000000e-01 : f32
    %362 = vector.broadcast %cst_138 : f32 to vector<16x32xf32>
    %363 = arith.mulf %362, %361 : vector<16x32xf32>
    %cst_139 = arith.constant 1.41421354 : f32
    %364 = vector.broadcast %cst_139 : f32 to vector<16x32xf32>
    %365 = arith.divf %361, %364 : vector<16x32xf32>
    %366 = math.erf %365 : vector<16x32xf32>
    %cst_140 = arith.constant 1.000000e+00 : f32
    %367 = vector.broadcast %cst_140 : f32 to vector<16x32xf32>
    %368 = arith.addf %367, %366 : vector<16x32xf32>
    %369 = arith.mulf %363, %368 : vector<16x32xf32>
    %c0_141 = arith.constant 0 : index
    %c0_142 = arith.constant 0 : index
    %370 = vector.load %arg8[%c0_141, %c0_142] : memref<32x128xf32, #tpu.memory_space<vmem>>, vector<32x128xf32>
    %cst_143 = arith.constant dense<0.000000e+00> : vector<16x128xf32>
    %371 = tpu.matmul %369, %370, %cst_143 {dimension_numbers = #tpu.dot_dimension_numbers<[1], [0], [0], [1], [0, 0, 1, 1], [], []>} : vector<16x32xf32>, vector<32x128xf32>, vector<16x128xf32> -> vector<16x128xf32>
    %372 = vector.broadcast %337 : vector<1x128xf32> to vector<16x128xf32>
    %373 = arith.addf %371, %372 : vector<16x128xf32>
    %c0_144 = arith.constant 0 : index
    %c0_145 = arith.constant 0 : index
    %374 = vector.load %arg10[%c0_144, %c0_145] : memref<16x128xf32, #tpu.memory_space<vmem>>, vector<16x128xf32>
    tpu.vector_store %arg10[%c0_144, %c0_145], %373 {strides = array<i32>} : memref<16x128xf32, #tpu.memory_space<vmem>>, vector<16x128xf32>,
    return
  }
}

</mosaic_0001>

<bundles_post_ra>
// kernel: tpu_custom_call.1
= control target key start
LH: loop header
LB: loop body
LE: loop exit
PB: predicated region body
PF: predicated region fallthrough
CT: control target
= control target key end

     0   :  { %vm69_vm0 = vcmask 261120   ;;  %s5051_s0 = inlined_call_operand.vmem [shape: f32[16,32], index: 0, kind: input, shape index: {}]   ;;  %s5052_s1 = inlined_call_operand.vmem [shape: s32[16,16], index: 1, kind: input, shape index: {}]   ;;  %s5053_s2 = inlined_call_operand.vmem [shape: f32[2,32,96], index: 2, kind: input, shape index: {}]   ;;  %s5054_s3 = inlined_call_operand.vmem [shape: f32[2,32,32], index: 3, kind: input, shape index: {}]   ;;  %s5055_s4 = inlined_call_operand.vmem [shape: f32[2,32,128], index: 4, kind: input, shape index: {}]   ;;  %s5056_s5 = inlined_call_operand.vmem [shape: f32[2,128,32], index: 5, kind: input, shape index: {}]   ;;  %s5057_s6 = inlined_call_operand.vmem [shape: f32[2,8,128], index: 6, kind: input, shape index: {}]   ;;  %s5058_s7 = inlined_call_operand.vmem [shape: f32[32,32], index: 7, kind: input, shape index: {}]   ;;  %s5059_s8 = inlined_call_operand.vmem [shape: f32[32,128], index: 8, kind: input, shape index: {}]   ;;  %s5060_s9 = inlined_call_operand.vmem [shape: f32[4,128], index: 9, kind: input, shape index: {}]   ;;  %s5061_s10 = inlined_call_operand.hbm [shape: f32[16,128], index: 10, kind: output, shape index: {}]  }
   0x1   :  { %v4428_v0 = vld [vmem:[%s5051_s0] sm:$0xff]  ;;  %v4433_v1 = vld [vmem:[%s5051_s0 + $0x8] sm:$0xff] }
   0x2   :  { %v70_v2 = vsel %vm69_vm0, %v4428_v0, 0.0 }
   0x3   :  { %15 = vsyncpa [#allocation3], 0  ;;  %71 = vadd.xlane.f32.xlu0 %v70_v2  ;;  %v73_v3 = vsel %vm69_vm0, %v4433_v1, 0.0  ;;  %v40_v14 = vld [vmem:[%s5053_s2] sm:$0xff]  ;;  %v41_v15 = vld [vmem:[%s5053_s2 + $0x8] sm:$0xff]  ;;  %v106_v25 = vlaneseq  ;;  %vm215_vm5 = vcmask 64512  }
   0x4   :  { %v42_v16 = vld [vmem:[%s5053_s2 + $0x10] sm:$0xff]  ;;  %v3930_v17 = vpack.c.bf16 %v41_v15, %v40_v14  ;;  %v43_v18 = vld [vmem:[%s5053_s2 + $0x18] sm:$0xff]  ;;  %v4461_v38 = vld [vmem:[%s5057_s6] sm:$0xff]  ;;  %s4356_s26 = smov 88   ;;  %s4357_s27 = smov 96   ;;  %vm305_vm8 = vcmask 130048  }
   0x5   :  { %v3934_v19 = vpack.c.bf16 %v43_v18, %v42_v16  ;;  %v4455_v30 = vshrl.u32 %v106_v25, 7  ;;  %s4358_s28 = smov 120   ;;  %s4359_s29 = smov 80   ;;  %vm4502_vm6 = vmpackc.low %vm215_vm5, %vm215_vm5  ;;  %v4532_v14 = vld [vmem:[%s5052_s1] sm:$0xff] }
   0x6   :  { %3931 = vmatprep.subr.bf16.mxu1 %v3930_v17  ;;  %s4360_s30 = smov 112   ;;  %vm301_vm9 = vcmp.ne.s32.totalorder %v4532_v14, 0  ;;  %s4362_s15 = smov 72  }
   0x7   :  { %74 = vadd.xlane.f32.xlu0 %v73_v3  ;;  %3933 = vmatpush3.bf16.msra.mxu1 %v3930_v17  ;;  %v108_v36 = vsub.s32 4, %v4455_v30  ;;  %v120_v41 = vsub.s32 5, %v4455_v30  ;;  %v126_v51 = vsub.s32 0, %v4455_v30  ;;  %s4363_s16 = smov 104   ;;  %s4364_s0 = smov 56  }
   0x8   :  { %3935 = vmatprep.subr.bf16.mxu1 %v3934_v19  ;;  %s4365_s21 = smov 48   ;;  %s4366_s24 = smov 40  }
   0x9   :  { %v109_v40 = vrot.slane %v4461_v38, %v108_v36  ;;  %v121_v43 = vrot.slane %v4461_v38, %v120_v41  ;;  %v127_v52 = vrot.slane %v4461_v38, %v126_v51  ;;  %s4367_s25 = smov [#allocation2]  }
   0xa   :  { %s3362_s11 = sshll.u32 %s4367_s25, 4  ;;  %s3363_s11 = int_to_ptr.vmem [resolvable:$true] %s3362_s11 }
   0xb   :  { %3937 = vmatpush3.bf16.msra.mxu1 %v3934_v19  ;;  %s4332_s12 = scalar_lea.vmem %s3363_s11, 256  ;;  %p4337_p1 = scmp.lt.s32.totalorder %s3363_s11, %s3363_s11 }
   0xc   :  { %p4333_p0 = scmp.ne.s32.totalorder %s3363_s11, %s4332_s12  ;;  %p4338_p2 = scmp.lt.s32.totalorder %s4332_s12, %s4332_s12 }
   0xe   :  { %p4339_p3 = por %p4338_p2, %p4337_p1 }
  0x10   :  { %p4340_p4 = pnand %p4339_p3, %p4333_p0 }
  0x90   :  { %v72_v4 = vpop.xlane.xlu0 %71 }
  0x91   :  { %v77_v5 = vmul.f32 0.03125, %v72_v4 }
  0x93   :  { %v79_v6 = vsub.f32 %v4428_v0, %v77_v5 }
  0x94   :  { %v75_v7 = vpop.xlane.xlu0 %74 }
  0x95   :  { %v78_v8 = vmul.f32 0.03125, %v75_v7  ;;  %v81_v9 = vmul.f32 %v79_v6, %v79_v6  ;;  %v110_v42 = vmul.f32 %v109_v40, %v79_v6 }
  0x97   :  { %v80_v10 = vsub.f32 %v4433_v1, %v78_v8  ;;  %v83_v11 = vsel %vm69_vm0, %v81_v9, 0.0 }
  0x98   :  { %84 = vadd.xlane.f32.xlu1 %v83_v11 }
  0x99   :  { %v82_v12 = vmul.f32 %v80_v10, %v80_v10  ;;  %v111_v46 = vmul.f32 %v109_v40, %v80_v10 }
  0x9b   :  { %v86_v13 = vsel %vm69_vm0, %v82_v12, 0.0 }
  0x9c   :  { %87 = vadd.xlane.f32.xlu1 %v86_v13  ;;  %v4527_v13 = vld [vmem:[%s5052_s1 + $0x8] sm:$0xff]  ;;  %s4361_s1 = smov 64  }
  0x9d   :  { %vm302_vm7 = vcmp.ne.s32.totalorder %v4527_v13, 0 }
 0x125   :  { %v85_v20 = vpop.xlane.xlu1 %84 }
 0x126   :  { %v90_v21 = vmul.f32 0.032258064, %v85_v20 }
 0x128   :  { %4228 = vrsqrt.f32 %v90_v21  ;;  %vm94_vm1 = vcmp.eq.f32.partialorder %v90_v21, inf  ;;  %v97_v27 = vand.u32 2147483648, %v90_v21  ;;  %vm96_vm2 = vcmp.eq.f32.partialorder %v90_v21, 0.0 }
 0x129   :  { %v88_v22 = vpop.xlane.xlu1 %87 }
 0x12a   :  { %v91_v23 = vmul.f32 0.032258064, %v88_v22 }
 0x12c   :  { %4230 = vrsqrt.f32 %v91_v23  ;;  %vm101_vm3 = vcmp.eq.f32.partialorder %v91_v23, inf  ;;  %v104_v34 = vand.u32 2147483648, %v91_v23  ;;  %vm103_vm4 = vcmp.eq.f32.partialorder %v91_v23, 0.0 }
 0x132   :  { %v4229_v24 = vpop.eup %4228 }
 0x133   :  { %v93_v26 = vmul.f32 %v4229_v24, %v90_v21 }
 0x135   :  { %v95_v28 = vsel %vm94_vm1, %v90_v21, %v93_v26 }
 0x136   :  { %v4231_v29 = vpop.eup %4230  ;;  %v98_v31 = vsel %vm96_vm2, %v97_v27, %v95_v28 }
 0x137   :  { %v100_v32 = vmul.f32 %v4231_v29, %v91_v23  ;;  %v112_v33 = vadd.f32 1e-06, %v98_v31 }
 0x139   :  { %v102_v35 = vsel %vm101_vm3, %v91_v23, %v100_v32  ;;  %4232 = vrcp.f32 %v112_v33 }
 0x13a   :  { %v105_v37 = vsel %vm103_vm4, %v104_v34, %v102_v35 }
 0x13b   :  { %v113_v39 = vadd.f32 1e-06, %v105_v37 }
 0x13d   :  { %4234 = vrcp.f32 %v113_v39 }
 0x143   :  { %v4233_v44 = vpop.eup %4232 }
 0x144   :  { %v115_v45 = vmul.f32 %v4233_v44, %v110_v42 }
 0x146   :  { %v122_v47 = vadd.f32 %v121_v43, %v115_v45 }
 0x147   :  { %v4235_v48 = vpop.eup %4234 }
 0x148   :  { %v117_v49 = vmul.f32 %v4235_v48, %v111_v46  ;;  %3650 = vmatprep.mubr.msk.f32.mxu1 %vm69_vm0, %v122_v47 }
 0x14a   :  { %v123_v50 = vadd.f32 %v121_v43, %v117_v49 }
 0x14c   :  { %3651 = vmatmul.mubr.msk.f32.vlgmr.msra.gmra.mrb[0].mxu1 %vm69_vm0, %v123_v50 }
 0x21f   :  { %v3652_v53 = vpop.f32.mrb[0].mxu1 }
 0x220   :  { %v4476_v54 = vadd.f32 %v3652_v53, %v127_v52  ;;  %v200_v55 = vpop.f32.mrb[1].mxu1 }
 0x221   :  { %v4478_v56 = vadd.f32 %v200_v55, %v127_v52 }
 0x223   :  { %3657 = vmatprep.mubr.msk.f32.mxu1 %vm215_vm5, %v4478_v56  ;;  %v4484_v57 = vpack.i.bf16 %v4476_v54, %v4478_v56 }
 0x225   :  { %4154 = vrot.lane.b32.xlu1 %v4484_v57, %s4356_s26  ;;  %4149 = vrot.lane.b32.xlu0 %v4484_v57, %s4357_s27 }
 0x229   :  { %415 = vrot.lane.b32.xlu1 %v4478_v56, %s4358_s28  ;;  %4159 = vrot.lane.b32.xlu0 %v4484_v57, %s4359_s29 }
 0x22d   :  { %417 = vrot.lane.b32.xlu1 %v4476_v54, %s4358_s28  ;;  %783 = vrot.lane.b32.xlu0 %v4476_v54, %s4360_s30 }
 0x231   :  { %781 = vrot.lane.b32.xlu1 %v4478_v56, %s4360_s30 }
 0x297   :  { %v4155_v58 = vpop.permute.xlu1 %4154  ;;  %v4150_v59 = vpop.permute.xlu0 %4149 }
 0x298   :  { %v4157_v60 = vunpack.i.h.bf16 %v4155_v58  ;;  %v4156_v61 = vunpack.i.l.bf16 %v4155_v58  ;;  %v4152_v62 = vunpack.i.h.bf16 %v4150_v59  ;;  %v4151_v63 = vunpack.i.l.bf16 %v4150_v59 }
 0x29a   :  { %v3938_v3 = vpack.c.bf16 %v4152_v62, %v4151_v63  ;;  %v3948_v4 = vpack.c.bf16 %v4157_v60, %v4156_v61 }
 0x29b   :  { %v4160_v5 = vpop.permute.xlu0 %4159  ;;  %v416_v6 = vpop.permute.xlu1 %415 }
 0x29c   :  { %3940 = vmatprep.subr.msk.bf16.mxu1 %vm4502_vm6, %v3938_v3  ;;  %v4162_v7 = vunpack.i.h.bf16 %v4160_v5  ;;  %v4161_v8 = vunpack.i.l.bf16 %v4160_v5 }
 0x29d   :  { %3943 = vmatpush3.bf16.xpose.msk.msra.mxu1 %vm4502_vm6, %v3938_v3 }
 0x29e   :  { %3950 = vmatprep.subr.msk.bf16.mxu1 %vm4502_vm6, %v3948_v4  ;;  %v3958_v9 = vpack.c.bf16 %v4162_v7, %v4161_v8 }
 0x29f   :  { %v418_v10 = vpop.permute.xlu1 %417  ;;  %v784_v12 = vpop.permute.xlu0 %783 }
 0x2a3   :  { %v782_v11 = vpop.permute.xlu1 %781 }
 0x2a4   :  { %3658 = vmatmul.mubr.msk.f32.vlgmr.msra.gmra.mrb[2].mxu1 %vm215_vm5, %v4476_v54 }
 0x2a5   :  { %3953 = vmatpush3.bf16.xpose.msk.msra.mxu1 %vm4502_vm6, %v3948_v4  ;;  %3671 = vmatprep.mubr.msk.f32.mxu1 %vm215_vm5, %v416_v6 }
 0x2a6   :  { %3960 = vmatprep.subr.msk.bf16.mxu1 %vm4502_vm6, %v3958_v9 }
 0x2ac   :  { %3672 = vmatmul.mubr.msk.f32.vlgmr.msra.gmra.mrb[4].mxu1 %vm215_vm5, %v418_v10 }
 0x2ad   :  { %3963 = vmatpush3.bf16.xpose.msk.msra.mxu1 %vm4502_vm6, %v3958_v9  ;;  %3695 = vmatprep.mubr.msk.f32.mxu1 %vm215_vm5, %v782_v11 }
 0x2b4   :  { %3696 = vmatmul.mubr.msk.f32.vlgmr.msra.gmra.mrb[6].mxu1 %vm215_vm5, %v784_v12 }
 0x377   :  { %v3659_v15 = vpop.f32.mrb[2].mxu1 }
 0x378   :  { %v300_v16 = vmul.f32 0.35355338, %v3659_v15  ;;  %v290_v17 = vpop.f32.mrb[3].mxu1 }
 0x379   :  { %v299_v18 = vmul.f32 0.35355338, %v290_v17 }
 0x37a   :  { %v304_v19 = vsel %vm302_vm7, %v300_v16, -1e+20 }
 0x37b   :  { %v309_v20 = vsel %vm305_vm8, %v304_v19, -inf  ;;  %v303_v21 = vsel %vm301_vm9, %v299_v18, -1e+20 }
 0x37c   :  { %310 = vmax.xlane.f32.xlu0 %v309_v20  ;;  %v306_v22 = vsel %vm305_vm8, %v303_v21, -inf }
 0x37d   :  { %307 = vmax.xlane.f32.xlu1 %v306_v22 }
 0x37f   :  { %v3673_v23 = vpop.f32.mrb[4].mxu1 }
 0x380   :  { %v497_v24 = vpop.f32.mrb[5].mxu1  ;;  %v507_v25 = vmul.f32 0.35355338, %v3673_v23 }
 0x381   :  { %v506_v26 = vmul.f32 0.35355338, %v497_v24 }
 0x382   :  { %v509_v29 = vsel %vm302_vm7, %v507_v25, -1e+20 }
 0x383   :  { %v508_v27 = vsel %vm301_vm9, %v506_v26, -1e+20  ;;  %v513_v33 = vsel %vm305_vm8, %v509_v29, -inf }
 0x384   :  { %v510_v28 = vsel %vm305_vm8, %v508_v27, -inf }
 0x385   :  { %511 = vmax.xlane.f32.xlu0 %v510_v28 }
 0x387   :  { %v3697_v31 = vpop.f32.mrb[6].mxu1 }
 0x388   :  { %v863_v32 = vpop.f32.mrb[7].mxu1  ;;  %v873_v3 = vmul.f32 0.35355338, %v3697_v31 }
 0x389   :  { %514 = vmax.xlane.f32.xlu0 %v513_v33  ;;  %v872_v61 = vmul.f32 0.35355338, %v863_v32 }
 0x38a   :  { %v875_v4 = vsel %vm302_vm7, %v873_v3, -1e+20 }
 0x38b   :  { %v874_v62 = vsel %vm301_vm9, %v872_v61, -1e+20 }
 0x38c   :  { %v876_v63 = vsel %vm305_vm8, %v874_v62, -inf }
 0x409   :  { %v311_v34 = vpop.xlane.xlu0 %310 }
 0x40a   :  { %v313_v35 = vsub.f32 %v304_v19, %v311_v34  ;;  %v308_v37 = vpop.xlane.xlu1 %307 }
 0x40b   :  { %v312_v39 = vsub.f32 %v303_v21, %v308_v37 }
 0x40c   :  { %v316_v40 = vmul.f32 1.442695, %v313_v35 }
 0x40d   :  { %v314_v42 = vmul.f32 1.442695, %v312_v39 }
 0x40e   :  { %4236 = vpow2.f32 %v316_v40 }
 0x40f   :  { %4238 = vpow2.f32 %v314_v42 }
 0x412   :  { %v512_v43 = vpop.xlane.xlu0 %511 }
 0x413   :  { %v516_v44 = vsub.f32 %v508_v27, %v512_v43 }
 0x415   :  { %v518_v45 = vmul.f32 1.442695, %v516_v44 }
 0x416   :  { %v515_v46 = vpop.xlane.xlu0 %514 }
 0x417   :  { %4240 = vpow2.f32 %v518_v45  ;;  %v517_v47 = vsub.f32 %v509_v29, %v515_v46  ;;  %v45_v46 = vld [vmem:[%s5054_s3 + $0x8] sm:$0xff] }
 0x418   :  { %v4237_v48 = vpop.eup %4236 }
 0x419   :  { %v4239_v49 = vpop.eup %4238  ;;  %v520_v50 = vmul.f32 1.442695, %v517_v47  ;;  %v321_v52 = vsel %vm305_vm8, %v4237_v48, 0.0  ;;  %v44_v47 = vld [vmem:[%s5054_s3] sm:$0xff] }
 0x41a   :  { %322 = vadd.xlane.f32.xlu0 %v321_v52  ;;  %v318_v53 = vsel %vm305_vm8, %v4239_v49, 0.0 }
 0x41b   :  { %4242 = vpow2.f32 %v520_v50  ;;  %319 = vadd.xlane.f32.xlu1 %v318_v53 }
 0x421   :  { %v4241_v55 = vpop.eup %4240 }
 0x422   :  { %v522_v58 = vsel %vm305_vm8, %v4241_v55, 0.0 }
 0x423   :  { %523 = vadd.xlane.f32.xlu1 %v522_v58 }
 0x425   :  { %v4243_v59 = vpop.eup %4242 }
 0x426   :  { %v525_v60 = vsel %vm305_vm8, %v4243_v59, 0.0 }
 0x427   :  { %526 = vadd.xlane.f32.xlu0 %v525_v60 }
 0x434   :  { %4164 = vrot.lane.b32.xlu1 %v4484_v57, %s4361_s1 }
 0x438   :  { %4174 = vrot.lane.b32.xlu1 %v4484_v57, %s4362_s15 }
 0x43c   :  { %1068 = vrot.lane.b32.xlu1 %v4478_v56, %s4363_s16  ;;  %v879_v56 = vsel %vm305_vm8, %v875_v4, -inf }
 0x43d   :  { %4169 = vrot.lane.b32.xlu0 %v4484_v57, %s4364_s0 }
 0x440   :  { %1070 = vrot.lane.b32.xlu1 %v4476_v54, %s4363_s16 }
 0x45c   :  { %877 = vmax.xlane.f32.xlu0 %v876_v63 }
 0x464   :  { %880 = vmax.xlane.f32.xlu1 %v879_v56 }
 0x4a7   :  { %v323_v6 = vpop.xlane.xlu0 %322 }
 0x4a8   :  { %v320_v5 = vpop.xlane.xlu1 %319 }
 0x4a9   :  { %4244 = vrcp.f32 %v320_v5 }
 0x4aa   :  { %4246 = vrcp.f32 %v323_v6 }
 0x4b0   :  { %v524_v7 = vpop.xlane.xlu1 %523 }
 0x4b1   :  { %4248 = vrcp.f32 %v524_v7 }
 0x4b3   :  { %v4245_v54 = vpop.eup %4244 }
 0x4b4   :  { %v527_v8 = vpop.xlane.xlu0 %526  ;;  %v4165_v9 = vpop.permute.xlu1 %4164  ;;  %v325_v10 = vmul.f32 %v4245_v54, %v4239_v49 }
 0x4b5   :  { %4250 = vrcp.f32 %v527_v8  ;;  %v4167_v11 = vunpack.i.h.bf16 %v4165_v9  ;;  %v4166_v12 = vunpack.i.l.bf16 %v4165_v9  ;;  %v4247_v16 = vpop.eup %4246 }
 0x4b6   :  { %3664 = vmatprep.mubr.msk.f32.mxu0 %vm305_vm8, %v325_v10  ;;  %v327_v26 = vmul.f32 %v4247_v16, %v4237_v48 }
 0x4b7   :  { %v3944_v15 = vpack.c.bf16 %v4167_v11, %v4166_v12  ;;  %v46_v11 = vld [vmem:[%s5054_s3 + $0x10] sm:$0xff] }
 0x4b8   :  { %v4170_v17 = vpop.permute.xlu0 %4169  ;;  %v4175_v18 = vpop.permute.xlu1 %4174 }
 0x4b9   :  { %v4172_v19 = vunpack.i.h.bf16 %v4170_v17  ;;  %v4171_v20 = vunpack.i.l.bf16 %v4170_v17  ;;  %v4177_v21 = vunpack.i.h.bf16 %v4175_v18  ;;  %v4176_v22 = vunpack.i.l.bf16 %v4175_v18  ;;  %3945 = vmatprep.subr.bf16.mxu0 %v3944_v15 }
 0x4ba   :  { %3947 = vmatpush3.bf16.msra.mxu0 %v3944_v15 }
 0x4bb   :  { %v4249_v23 = vpop.eup %4248  ;;  %v3954_v24 = vpack.c.bf16 %v4172_v19, %v4171_v20  ;;  %v3968_v25 = vpack.c.bf16 %v4177_v21, %v4176_v22 }
 0x4bc   :  { %v1069_v27 = vpop.permute.xlu1 %1068  ;;  %v529_v28 = vmul.f32 %v4249_v23, %v4241_v55 }
 0x4bd   :  { %3665 = vmatmul.mubr.msk.f32.vlgmr.msra.gmra.mrb[0].mxu0 %vm305_vm8, %v327_v26  ;;  %3955 = vmatprep.subr.bf16.mxu0 %v3954_v24 }
 0x4be   :  { %3970 = vmatprep.subr.msk.bf16.mxu1 %vm4502_vm6, %v3968_v25  ;;  %3714 = vmatprep.mubr.msk.f32.mxu1 %vm215_vm5, %v1069_v27 }
 0x4bf   :  { %v4251_v29 = vpop.eup %4250  ;;  %3957 = vmatpush3.bf16.msra.mxu0 %v3954_v24  ;;  %3678 = vmatprep.mubr.msk.f32.mxu0 %vm305_vm8, %v529_v28 }
 0x4c0   :  { %v531_v31 = vmul.f32 %v4251_v29, %v4243_v59  ;;  %3973 = vmatpush3.bf16.xpose.msk.msra.mxu1 %vm4502_vm6, %v3968_v25  ;;  %v1071_v32 = vpop.permute.xlu1 %1070  ;;  %3681 = vmatprep.subr.mxu0 %v45_v46 }
 0x4c2   :  { %3679 = vmatmul.mubr.msk.f32.vlgmr.msra.gmra.mrb[2].mxu0 %vm305_vm8, %v531_v31 }
 0x4c3   :  { %3682 = vmatpush3.msra.mxu0 %v45_v46 }
 0x4c4   :  { %3686 = vmatprep.subr.mxu0 %v44_v47 }
 0x4c7   :  { %3715 = vmatmul.mubr.msk.f32.vlgmr.msra.gmra.mrb[8].mxu1 %vm215_vm5, %v1071_v32 }
 0x4e9   :  { %v878_v33 = vpop.xlane.xlu0 %877 }
 0x4ea   :  { %v882_v34 = vsub.f32 %v874_v62, %v878_v33  ;;  %v47_v33 = vld [vmem:[%s5054_s3 + $0x18] sm:$0xff] }
 0x4ec   :  { %v884_v39 = vmul.f32 1.442695, %v882_v34 }
 0x4f1   :  { %v881_v35 = vpop.xlane.xlu1 %880 }
 0x4f2   :  { %v883_v37 = vsub.f32 %v875_v4, %v881_v35 }
 0x4f4   :  { %v886_v40 = vmul.f32 1.442695, %v883_v37 }
 0x4f6   :  { %4252 = vpow2.f32 %v886_v40 }
 0x4f7   :  { %4254 = vpow2.f32 %v884_v39 }
 0x500   :  { %v4253_v42 = vpop.eup %4252 }
 0x501   :  { %v891_v43 = vsel %vm305_vm8, %v4253_v42, 0.0  ;;  %v4255_v44 = vpop.eup %4254 }
 0x502   :  { %892 = vadd.xlane.f32.xlu0 %v891_v43  ;;  %v888_v45 = vsel %vm305_vm8, %v4255_v44, 0.0 }
 0x506   :  { %889 = vadd.xlane.f32.xlu0 %v888_v45 }
 0x51c   :  { %4179 = vrot.lane.b32.xlu0 %v4484_v57, %s4365_s21 }
 0x58f   :  { %v893_v48 = vpop.xlane.xlu0 %892 }
 0x590   :  { %v3666_v49 = vpop.f32.mrb[0].mxu0 }
 0x591   :  { %v406_v50 = vpop.f32.mrb[1].mxu0 }
 0x593   :  { %v890_v52 = vpop.xlane.xlu0 %889 }
 0x594   :  { %4256 = vrcp.f32 %v890_v52 }
 0x595   :  { %4258 = vrcp.f32 %v893_v48  ;;  %v3680_v53 = vpop.f32.mrb[2].mxu0 }
 0x596   :  { %v610_v55 = vpop.f32.mrb[3].mxu0 }
 0x597   :  { %v4180_v58 = vpop.permute.xlu0 %4179  ;;  %3683 = vmatprep.mubr.msk.f32.mxu0 %vm215_vm5, %v610_v55 }
 0x598   :  { %v4182_v59 = vunpack.i.h.bf16 %v4180_v58  ;;  %v4181_v60 = vunpack.i.l.bf16 %v4180_v58  ;;  %3684 = vmatmul.mubr.msk.f32.vlgmr.msra.gmra.mrb[4].mxu0 %vm215_vm5, %v3680_v53 }
 0x599   :  { %3688 = vmatprep.mubr.msk.f32.mxu0 %vm215_vm5, %v406_v50  ;;  %3687 = vmatpush3.msra.mxu0 %v44_v47 }
 0x59a   :  { %v3964_v61 = vpack.c.bf16 %v4182_v59, %v4181_v60  ;;  %v3716_v62 = vpop.f32.mrb[8].mxu1 }
 0x59b   :  { %v1150_v63 = vpop.f32.mrb[9].mxu1  ;;  %v1160_v3 = vmul.f32 0.35355338, %v3716_v62 }
 0x59c   :  { %v1159_v4 = vmul.f32 0.35355338, %v1150_v63  ;;  %3965 = vmatprep.subr.bf16.mxu0 %v3964_v61 }
 0x59d   :  { %v1162_v8 = vsel %vm302_vm7, %v1160_v3, -1e+20  ;;  %v48_v3 = vld [vmem:[%s5055_s4] sm:$0xff] }
 0x59e   :  { %v4257_v56 = vpop.eup %4256  ;;  %v1161_v5 = vsel %vm301_vm9, %v1159_v4, -1e+20  ;;  %v1166_v10 = vsel %vm305_vm8, %v1162_v8, -inf  ;;  %v49_v4 = vld [vmem:[%s5055_s4 + $0x8] sm:$0xff] }
 0x59f   :  { %v4259_v6 = vpop.eup %4258  ;;  %v1163_v7 = vsel %vm305_vm8, %v1161_v5, -inf  ;;  %v895_v54 = vmul.f32 %v4257_v56, %v4255_v44  ;;  %v50_v56 = vld [vmem:[%s5055_s4 + $0x10] sm:$0xff] }
 0x5a0   :  { %1164 = vmax.xlane.f32.xlu1 %v1163_v7  ;;  %3689 = vmatmul.mubr.msk.f32.vlgmr.msra.gmra.mrb[4].mxu0 %vm215_vm5, %v3666_v49  ;;  %v897_v9 = vmul.f32 %v4259_v6, %v4253_v42  ;;  %v1359_v42 = vsub.s32 2, %v4455_v30  ;;  %v51_v6 = vld [vmem:[%s5055_s4 + $0x18] sm:$0xff] }
 0x5a1   :  { %3967 = vmatpush3.bf16.msra.mxu0 %v3964_v61  ;;  %3702 = vmatprep.mubr.msk.f32.mxu0 %vm305_vm8, %v895_v54  ;;  %v3982_v7 = vpack.c.bf16 %v51_v6, %v50_v56  ;;  %v52_v54 = vld [vmem:[%s5056_s5] sm:$0xff]  ;;  %v67_v6 = vld [vmem:[%s5056_s5 + $0x78] sm:$0xff] }
 0x5a2   :  { %3705 = vmatprep.subr.mxu0 %v46_v11  ;;  %v1360_v43 = vrot.slane %v4461_v38, %v1359_v42 }
 0x5a4   :  { %1167 = vmax.xlane.f32.xlu1 %v1166_v10  ;;  %3703 = vmatmul.mubr.msk.f32.vlgmr.msra.gmra.mrb[6].mxu0 %vm305_vm8, %v897_v9  ;;  %v54_v9 = vld [vmem:[%s5056_s5 + $0x10] sm:$0xff] }
 0x5a5   :  { %3706 = vmatpush3.msra.mxu0 %v46_v11  ;;  %v55_v11 = vld [vmem:[%s5056_s5 + $0x18] sm:$0xff] }
 0x62d   :  { %v1165_v12 = vpop.xlane.xlu1 %1164 }
 0x62e   :  { %v1169_v15 = vsub.f32 %v1161_v5, %v1165_v12  ;;  %v3978_v5 = vpack.c.bf16 %v49_v4, %v48_v3  ;;  %v3990_v12 = vpack.c.bf16 %v55_v11, %v54_v9 }
 0x630   :  { %v1171_v18 = vmul.f32 1.442695, %v1169_v15  ;;  %3979 = vmatprep.subr.bf16.mxu1 %v3978_v5  ;;  %v56_v15 = vld [vmem:[%s5056_s5 + $0x20] sm:$0xff] }
 0x631   :  { %v1168_v16 = vpop.xlane.xlu1 %1167  ;;  %3981 = vmatpush3.bf16.msra.mxu1 %v3978_v5 }
 0x632   :  { %v1170_v17 = vsub.f32 %v1162_v8, %v1168_v16  ;;  %3983 = vmatprep.subr.bf16.mxu1 %v3982_v7  ;;  %v53_v8 = vld [vmem:[%s5056_s5 + $0x8] sm:$0xff] }
 0x633   :  { %v3986_v10 = vpack.c.bf16 %v53_v8, %v52_v54  ;;  %v57_v16 = vld [vmem:[%s5056_s5 + $0x28] sm:$0xff] }
 0x634   :  { %v1173_v19 = vmul.f32 1.442695, %v1170_v17  ;;  %v3994_v17 = vpack.c.bf16 %v57_v16, %v56_v15  ;;  %v1504_v16 = vsub.s32 3, %v4455_v30 }
 0x635   :  { %3985 = vmatpush3.bf16.msra.mxu1 %v3982_v7 }
 0x636   :  { %4260 = vpow2.f32 %v1173_v19  ;;  %v59_v19 = vld [vmem:[%s5056_s5 + $0x38] sm:$0xff] }
 0x637   :  { %4262 = vpow2.f32 %v1171_v18  ;;  %v58_v18 = vld [vmem:[%s5056_s5 + $0x30] sm:$0xff] }
 0x640   :  { %v4261_v20 = vpop.eup %4260 }
 0x641   :  { %v1178_v21 = vsel %vm305_vm8, %v4261_v20, 0.0  ;;  %v4263_v22 = vpop.eup %4262 }
 0x642   :  { %1179 = vadd.xlane.f32.xlu1 %v1178_v21  ;;  %v1175_v23 = vsel %vm305_vm8, %v4263_v22, 0.0  ;;  %v60_v21 = vld [vmem:[%s5056_s5 + $0x40] sm:$0xff] }
 0x646   :  { %1176 = vadd.xlane.f32.xlu1 %v1175_v23 }
 0x657   :  { %4184 = vrot.lane.b32.xlu1 %v4484_v57, %s4366_s24 }
 0x677   :  { %v3704_v24 = vpop.f32.mrb[6].mxu0 }
 0x678   :  { %v976_v25 = vpop.f32.mrb[7].mxu0 }
 0x679   :  { %3707 = vmatprep.mubr.msk.f32.mxu0 %vm215_vm5, %v976_v25  ;;  %v63_v25 = vld [vmem:[%s5056_s5 + $0x58] sm:$0xff] }
 0x67a   :  { %3708 = vmatmul.mubr.msk.f32.vlgmr.msra.gmra.mrb[4].mxu0 %vm215_vm5, %v3704_v24  ;;  %v62_v24 = vld [vmem:[%s5056_s5 + $0x50] sm:$0xff] }
 0x6cf   :  { %v1180_v26 = vpop.xlane.xlu1 %1179 }
 0x6d0   :  { %4264 = vrcp.f32 %v1180_v26  ;;  %v4006_v26 = vpack.c.bf16 %v63_v25, %v62_v24 }
 0x6d3   :  { %v1177_v27 = vpop.xlane.xlu1 %1176 }
 0x6d4   :  { %4266 = vrcp.f32 %v1177_v27  ;;  %v64_v27 = vld [vmem:[%s5056_s5 + $0x60] sm:$0xff] }
 0x6d7   :  { %v4185_v28 = vpop.permute.xlu1 %4184 }
 0x6d8   :  { %v4187_v29 = vunpack.i.h.bf16 %v4185_v28  ;;  %v4186_v31 = vunpack.i.l.bf16 %v4185_v28  ;;  %v65_v28 = vld [vmem:[%s5056_s5 + $0x68] sm:$0xff] }
 0x6da   :  { %v3974_v32 = vpack.c.bf16 %v4187_v29, %v4186_v31  ;;  %v4265_v57 = vpop.eup %4264  ;;  %v4010_v29 = vpack.c.bf16 %v65_v28, %v64_v27 }
 0x6db   :  { %v1184_v37 = vmul.f32 %v4265_v57, %v4261_v20  ;;  %v3998_v20 = vpack.c.bf16 %v59_v19, %v58_v18 }
 0x6dc   :  { %3975 = vmatprep.subr.bf16.mxu0 %v3974_v32 }
 0x6dd   :  { %3977 = vmatpush3.bf16.msra.mxu0 %v3974_v32 }
 0x6de   :  { %v4267_v34 = vpop.eup %4266  ;;  %3724 = vmatprep.subr.mxu0 %v47_v33 }
 0x6df   :  { %v1182_v35 = vmul.f32 %v4267_v34, %v4263_v22  ;;  %v61_v22 = vld [vmem:[%s5056_s5 + $0x48] sm:$0xff] }
 0x6e0   :  { %v4002_v23 = vpack.c.bf16 %v61_v22, %v60_v21 }
 0x6e1   :  { %3721 = vmatprep.mubr.msk.f32.mxu0 %vm305_vm8, %v1182_v35 }
 0x6e2   :  { %3722 = vmatmul.mubr.msk.f32.vlgmr.msra.gmra.mrb[8].mxu0 %vm305_vm8, %v1184_v37 }
 0x6e3   :  { %3725 = vmatpush3.msra.mxu0 %v47_v33 }
 0x6e4   :  { %3987 = vmatprep.subr.bf16.mxu0 %v3986_v10 }
 0x7b5   :  { %v3723_v39 = vpop.f32.mrb[8].mxu0 }
 0x7b6   :  { %v1263_v40 = vpop.f32.mrb[9].mxu0 }
 0x7b7   :  { %3726 = vmatprep.mubr.msk.f32.mxu0 %vm215_vm5, %v1263_v40 }
 0x7b8   :  { %3727 = vmatmul.mubr.msk.f32.vlgmr.msra.gmra.mrb[4].mxu0 %vm215_vm5, %v3723_v39 }
 0x7b9   :  { %3989 = vmatpush3.bf16.msra.mxu0 %v3986_v10 }
 0x7ba   :  { %3991 = vmatprep.subr.bf16.mxu0 %v3990_v12 }
 0x7bd   :  { %3993 = vmatpush3.bf16.msra.mxu0 %v3990_v12 }
 0x7be   :  { %3995 = vmatprep.subr.bf16.mxu0 %v3994_v17 }
 0x7c1   :  { %3997 = vmatpush3.bf16.msra.mxu0 %v3994_v17  ;;  %v1505_v17 = vrot.slane %v4461_v38, %v1504_v16 }
 0x7c2   :  { %3999 = vmatprep.subr.bf16.mxu0 %v3998_v20 }
 0x7c5   :  { %4001 = vmatpush3.bf16.msra.mxu0 %v3998_v20 }
 0x7c6   :  { %4003 = vmatprep.subr.bf16.mxu0 %v4002_v23 }
 0x7c9   :  { %4005 = vmatpush3.bf16.msra.mxu0 %v4002_v23 }
 0x7ca   :  { %4007 = vmatprep.subr.bf16.mxu0 %v4006_v26 }
 0x7cd   :  { %4009 = vmatpush3.bf16.msra.mxu0 %v4006_v26 }
 0x7ce   :  { %4011 = vmatprep.subr.bf16.mxu0 %v4010_v29 }
 0x7d1   :  { %4013 = vmatpush3.bf16.msra.mxu0 %v4010_v29 }
 0x88b   :  { %v3728_v44 = vpop.f32.mrb[4].mxu0 }
 0x88c   :  { %v1356_v45 = vadd.f32 %v3728_v44, %v4433_v1  ;;  %v1344_v46 = vpop.f32.mrb[5].mxu0 }
 0x88d   :  { %v1355_v47 = vadd.f32 %v1344_v46, %v4428_v0 }
 0x88e   :  { %v4622_v48 = vadd.f32 %v1360_v43, %v1356_v45 }
 0x88f   :  { %v4624_v49 = vadd.f32 %v1360_v43, %v1355_v47 }
 0x890   :  { %v1366_v50 = vsel %vm69_vm0, %v4622_v48, 0.0 }
 0x891   :  { %1367 = vadd.xlane.f32.xlu1 %v1366_v50  ;;  %v1363_v52 = vsel %vm69_vm0, %v4624_v49, 0.0  ;;  %v1399_v50 = vsub.s32 6, %v4455_v30 }
 0x892   :  { %1364 = vadd.xlane.f32.xlu0 %v1363_v52 }
 0x91e   :  { %v1368_v53 = vpop.xlane.xlu1 %1367 }
 0x91f   :  { %v1370_v55 = vmul.f32 0.03125, %v1368_v53  ;;  %v1365_v58 = vpop.xlane.xlu0 %1364 }
 0x920   :  { %v1369_v59 = vmul.f32 0.03125, %v1365_v58  ;;  %v1411_v58 = vsub.s32 7, %v4455_v30 }
 0x921   :  { %v4631_v1 = vsub.f32 %v4622_v48, %v1370_v55  ;;  %v1400_v55 = vrot.slane %v4461_v38, %v1399_v50 }
 0x922   :  { %v4634_v0 = vsub.f32 %v4624_v49, %v1369_v59 }
 0x923   :  { %v1374_v62 = vmul.f32 %v4631_v1, %v4631_v1 }
 0x924   :  { %v1373_v60 = vmul.f32 %v4634_v0, %v4634_v0  ;;  %v1401_v59 = vmul.f32 %v1400_v55, %v4634_v0  ;;  %v66_v0 = vld [vmem:[%s5056_s5 + $0x70] sm:$0xff] }
 0x925   :  { %v1378_v63 = vsel %vm69_vm0, %v1374_v62, 0.0  ;;  %v4014_v7 = vpack.c.bf16 %v67_v6, %v66_v0 }
 0x926   :  { %v1375_v61 = vsel %vm69_vm0, %v1373_v60, 0.0  ;;  %v1412_v60 = vrot.slane %v4461_v38, %v1411_v58 }
 0x927   :  { %1376 = vadd.xlane.f32.xlu0 %v1375_v61  ;;  %4015 = vmatprep.subr.bf16.mxu0 %v4014_v7 }
 0x928   :  { %4017 = vmatpush3.bf16.msra.mxu0 %v4014_v7 }
 0x92b   :  { %1379 = vadd.xlane.f32.xlu0 %v1378_v63  ;;  %v1402_v63 = vmul.f32 %v1400_v55, %v4631_v1  ;;  %v1417_v1 = vsub.s32 1, %v4455_v30 }
 0x92d   :  { %v1418_v54 = vrot.slane %v4461_v38, %v1417_v1 }
 0x9b4   :  { %v1377_v31 = vpop.xlane.xlu0 %1376 }
 0x9b5   :  { %v1381_v32 = vmul.f32 0.032258064, %v1377_v31 }
 0x9b7   :  { %4268 = vrsqrt.f32 %v1381_v32  ;;  %vm1385_vm10 = vcmp.eq.f32.partialorder %v1381_v32, inf  ;;  %v1388_v37 = vand.u32 2147483648, %v1381_v32  ;;  %vm1387_vm11 = vcmp.eq.f32.partialorder %v1381_v32, 0.0 }
 0x9b8   :  { %v1380_v33 = vpop.xlane.xlu0 %1379 }
 0x9b9   :  { %v1382_v57 = vmul.f32 0.032258064, %v1380_v33 }
 0x9bb   :  { %4270 = vrsqrt.f32 %v1382_v57  ;;  %vm1392_vm12 = vcmp.eq.f32.partialorder %v1382_v57, inf  ;;  %v1395_v46 = vand.u32 2147483648, %v1382_v57  ;;  %vm1394_vm13 = vcmp.eq.f32.partialorder %v1382_v57, 0.0 }
 0x9c1   :  { %v4269_v34 = vpop.eup %4268 }
 0x9c2   :  { %v1384_v35 = vmul.f32 %v4269_v34, %v1381_v32  ;;  %v3410_v34 = vld [vmem:[%s5053_s2 + $0x28] sm:$0xff] }
 0x9c4   :  { %v1386_v39 = vsel %vm1385_vm10, %v1381_v32, %v1384_v35  ;;  %v3411_v35 = vld [vmem:[%s5053_s2 + $0x30] sm:$0xff] }
 0x9c5   :  { %v4271_v40 = vpop.eup %4270  ;;  %v1389_v43 = vsel %vm1387_vm11, %v1388_v37, %v1386_v39  ;;  %v3412_v39 = vld [vmem:[%s5053_s2 + $0x38] sm:$0xff] }
 0x9c6   :  { %v1391_v44 = vmul.f32 %v4271_v40, %v1382_v57  ;;  %v1403_v45 = vadd.f32 1e-06, %v1389_v43  ;;  %v4022_v40 = vpack.c.bf16 %v3412_v39, %v3411_v35 }
 0x9c8   :  { %v1393_v47 = vsel %vm1392_vm12, %v1382_v57, %v1391_v44  ;;  %4272 = vrcp.f32 %v1403_v45  ;;  %v3409_v57 = vld [vmem:[%s5053_s2 + $0x20] sm:$0xff] }
 0x9c9   :  { %v1396_v52 = vsel %vm1394_vm13, %v1395_v46, %v1393_v47  ;;  %v4018_v37 = vpack.c.bf16 %v3410_v34, %v3409_v57 }
 0x9ca   :  { %v1404_v53 = vadd.f32 1e-06, %v1396_v52 }
 0x9cb   :  { %4019 = vmatprep.subr.bf16.mxu1 %v4018_v37 }
 0x9cc   :  { %4274 = vrcp.f32 %v1404_v53 }
 0x9d2   :  { %v4273_v61 = vpop.eup %4272 }
 0x9d3   :  { %v1406_v62 = vmul.f32 %v4273_v61, %v1401_v59 }
 0x9d5   :  { %v1413_v3 = vadd.f32 %v1412_v60, %v1406_v62 }
 0x9d6   :  { %v4275_v4 = vpop.eup %4274 }
 0x9d7   :  { %v1408_v56 = vmul.f32 %v4275_v4, %v1402_v63  ;;  %3737 = vmatprep.mubr.msk.f32.mxu1 %vm69_vm0, %v1413_v3 }
 0x9d9   :  { %v1414_v5 = vadd.f32 %v1412_v60, %v1408_v56  ;;  %v4751_v56 = vld [vmem:[%s5057_s6 + $0x8] sm:$0xff] }
 0x9da   :  { %v1654_v0 = vrot.slane %v4751_v56, %v108_v36  ;;  %v1666_v6 = vrot.slane %v4751_v56, %v120_v41  ;;  %v1672_v36 = vrot.slane %v4751_v56, %v126_v51 }
 0x9db   :  { %3738 = vmatmul.mubr.msk.f32.vlgmr.msra.gmra.mrb[10].mxu1 %vm69_vm0, %v1414_v5 }
 0x9dc   :  { %4021 = vmatpush3.bf16.msra.mxu1 %v4018_v37 }
 0x9dd   :  { %4023 = vmatprep.subr.bf16.mxu1 %v4022_v40 }
 0x9e0   :  { %4025 = vmatpush3.bf16.msra.mxu1 %v4022_v40 }
 0xaae   :  { %v3739_v8 = vpop.f32.mrb[10].mxu1 }
 0xaaf   :  { %v1497_v9 = vadd.f32 %v3739_v8, %v1418_v54  ;;  %v1491_v10 = vpop.f32.mrb[11].mxu1 }
 0xab0   :  { %v1492_v11 = vadd.f32 %v1491_v10, %v1418_v54 }
 0xab1   :  { %v1501_v15 = vmax.f32 %v1497_v9, 0.0 }
 0xab2   :  { %v1500_v12 = vmax.f32 %v1492_v11, 0.0 }
 0xab4   :  { %3772 = vmatprep.mubr.f32.mxu0 %v1500_v12 }
 0xab5   :  { %3773 = vmatmul.mubr.f32.vlgmr.msra.gmra.mrb[10].mxu0 %v1501_v15 }
 0xb88   :  { %v3774_v18 = vpop.f32.mrb[10].mxu0 }
 0xb89   :  { %v1572_v19 = vpop.f32.mrb[11].mxu0  ;;  %v1578_v20 = vadd.f32 %v3774_v18, %v1505_v17 }
 0xb8a   :  { %v1573_v21 = vadd.f32 %v1572_v19, %v1505_v17 }
 0xb8b   :  { %v4726_v23 = vadd.f32 %v1578_v20, %v4622_v48 }
 0xb8c   :  { %v4723_v22 = vadd.f32 %v1573_v21, %v4624_v49 }
 0xb8d   :  { %v1620_v25 = vsel %vm69_vm0, %v4726_v23, 0.0 }
 0xb8e   :  { %v1617_v24 = vsel %vm69_vm0, %v4723_v22, 0.0 }
 0xb8f   :  { %1618 = vadd.xlane.f32.xlu0 %v1617_v24 }
 0xb93   :  { %1621 = vadd.xlane.f32.xlu0 %v1620_v25 }
 0xc1c   :  { %v1619_v26 = vpop.xlane.xlu0 %1618 }
 0xc1d   :  { %v1623_v38 = vmul.f32 0.03125, %v1619_v26 }
 0xc1f   :  { %v1625_v27 = vsub.f32 %v4723_v22, %v1623_v38 }
 0xc20   :  { %v1622_v28 = vpop.xlane.xlu0 %1621 }
 0xc21   :  { %v1624_v29 = vmul.f32 0.03125, %v1622_v28  ;;  %v1627_v31 = vmul.f32 %v1625_v27, %v1625_v27  ;;  %v1655_v7 = vmul.f32 %v1654_v0, %v1625_v27 }
 0xc23   :  { %v1626_v49 = vsub.f32 %v4726_v23, %v1624_v29  ;;  %v1629_v48 = vsel %vm69_vm0, %v1627_v31, 0.0 }
 0xc24   :  { %1630 = vadd.xlane.f32.xlu0 %v1629_v48 }
 0xc25   :  { %v1628_v32 = vmul.f32 %v1626_v49, %v1626_v49  ;;  %v1656_v9 = vmul.f32 %v1654_v0, %v1626_v49 }
 0xc27   :  { %v1632_v33 = vsel %vm69_vm0, %v1628_v32, 0.0 }
 0xc28   :  { %1633 = vadd.xlane.f32.xlu1 %v1632_v33 }
 0xcb1   :  { %v1631_v43 = vpop.xlane.xlu0 %1630 }
 0xcb2   :  { %v1635_v44 = vmul.f32 0.032258064, %v1631_v43 }
 0xcb4   :  { %4276 = vrsqrt.f32 %v1635_v44  ;;  %vm1639_vm14 = vcmp.eq.f32.partialorder %v1635_v44, inf  ;;  %v1642_v53 = vand.u32 2147483648, %v1635_v44  ;;  %vm1641_vm15 = vcmp.eq.f32.partialorder %v1635_v44, 0.0 }
 0xcb5   :  { %v1634_v45 = vpop.xlane.xlu1 %1633 }
 0xcb6   :  { %v1636_v46 = vmul.f32 0.032258064, %v1634_v45 }
 0xcb8   :  { %4278 = vrsqrt.f32 %v1636_v46  ;;  %vm1646_vm1 = vcmp.eq.f32.partialorder %v1636_v46, inf  ;;  %v1649_v63 = vand.u32 2147483648, %v1636_v46  ;;  %vm1648_vm2 = vcmp.eq.f32.partialorder %v1636_v46, 0.0 }
 0xcbe   :  { %v4277_v47 = vpop.eup %4276 }
 0xcbf   :  { %v1638_v52 = vmul.f32 %v4277_v47, %v1635_v44 }
 0xcc1   :  { %v1640_v55 = vsel %vm1639_vm14, %v1635_v44, %v1638_v52 }
 0xcc2   :  { %v4279_v59 = vpop.eup %4278  ;;  %v1643_v60 = vsel %vm1641_vm15, %v1642_v53, %v1640_v55 }
 0xcc3   :  { %v1645_v61 = vmul.f32 %v4279_v59, %v1636_v46  ;;  %v1657_v62 = vadd.f32 1e-06, %v1643_v60 }
 0xcc5   :  { %v1647_v3 = vsel %vm1646_vm1, %v1636_v46, %v1645_v61  ;;  %4280 = vrcp.f32 %v1657_v62 }
 0xcc6   :  { %v1650_v4 = vsel %vm1648_vm2, %v1649_v63, %v1647_v3 }
 0xcc7   :  { %v1658_v5 = vadd.f32 1e-06, %v1650_v4 }
 0xcc9   :  { %4282 = vrcp.f32 %v1658_v5 }
 0xccf   :  { %v4281_v54 = vpop.eup %4280 }
 0xcd0   :  { %v1660_v8 = vmul.f32 %v4281_v54, %v1655_v7 }
 0xcd2   :  { %v1667_v10 = vadd.f32 %v1666_v6, %v1660_v8 }
 0xcd3   :  { %v4283_v11 = vpop.eup %4282 }
 0xcd4   :  { %3783 = vmatprep.mubr.msk.f32.mxu1 %vm69_vm0, %v1667_v10  ;;  %v1662_v12 = vmul.f32 %v4283_v11, %v1656_v9 }
 0xcd6   :  { %v1668_v15 = vadd.f32 %v1666_v6, %v1662_v12 }
 0xcd8   :  { %3784 = vmatmul.mubr.msk.f32.vlgmr.msra.gmra.mrb[12].mxu1 %vm69_vm0, %v1668_v15 }
 0xdab   :  { %v3785_v17 = vpop.f32.mrb[12].mxu1 }
 0xdac   :  { %v4764_v18 = vadd.f32 %v3785_v17, %v1672_v36  ;;  %v1745_v41 = vpop.f32.mrb[13].mxu1 }
 0xdad   :  { %v4766_v19 = vadd.f32 %v1745_v41, %v1672_v36 }
 0xdaf   :  { %3790 = vmatprep.mubr.msk.f32.mxu1 %vm215_vm5, %v4766_v19  ;;  %v4772_v20 = vpack.i.bf16 %v4764_v18, %v4766_v19 }
 0xdb1   :  { %4189 = vrot.lane.b32.xlu0 %v4772_v20, %s4357_s27 }
 0xdb5   :  { %4199 = vrot.lane.b32.xlu0 %v4772_v20, %s4356_s26 }
 0xdb9   :  { %1956 = vrot.lane.b32.xlu0 %v4766_v19, %s4358_s28 }
 0xdbd   :  { %1958 = vrot.lane.b32.xlu0 %v4764_v18, %s4358_s28 }
 0xe23   :  { %v4190_v51 = vpop.permute.xlu0 %4189 }
 0xe24   :  { %v4192_v21 = vunpack.i.h.bf16 %v4190_v51  ;;  %v4191_v24 = vunpack.i.l.bf16 %v4190_v51 }
 0xe26   :  { %v4026_v25 = vpack.c.bf16 %v4192_v21, %v4191_v24 }
 0xe27   :  { %v4200_v47 = vpop.permute.xlu0 %4199 }
 0xe28   :  { %4028 = vmatprep.subr.msk.bf16.mxu1 %vm4502_vm6, %v4026_v25  ;;  %v4202_v53 = vunpack.i.h.bf16 %v4200_v47  ;;  %v4201_v55 = vunpack.i.l.bf16 %v4200_v47 }
 0xe29   :  { %4031 = vmatpush3.bf16.xpose.msk.msra.mxu1 %vm4502_vm6, %v4026_v25 }
 0xe2a   :  { %v4036_v62 = vpack.c.bf16 %v4202_v53, %v4201_v55 }
 0xe2b   :  { %v1957_v0 = vpop.permute.xlu0 %1956 }
 0xe2f   :  { %v1959_v6 = vpop.permute.xlu0 %1958 }
 0xe30   :  { %3791 = vmatmul.mubr.msk.f32.vlgmr.msra.gmra.mrb[14].mxu1 %vm215_vm5, %v4764_v18 }
 0xf03   :  { %v3792_v26 = vpop.f32.mrb[14].mxu1 }
 0xf04   :  { %v1834_v38 = vpop.f32.mrb[15].mxu1  ;;  %v1844_v27 = vmul.f32 0.35355338, %v3792_v26 }
 0xf05   :  { %v1843_v28 = vmul.f32 0.35355338, %v1834_v38 }
 0xf06   :  { %v1846_v49 = vsel %vm302_vm7, %v1844_v27, -1e+20 }
 0xf07   :  { %v1845_v29 = vsel %vm301_vm9, %v1843_v28, -1e+20  ;;  %v1850_v48 = vsel %vm305_vm8, %v1846_v49, -inf }
 0xf08   :  { %v1847_v31 = vsel %vm305_vm8, %v1845_v29, -inf }
 0xf09   :  { %1848 = vmax.xlane.f32.xlu1 %v1847_v31 }
 0xf0d   :  { %1851 = vmax.xlane.f32.xlu1 %v1850_v48 }
 0xf96   :  { %v1849_v32 = vpop.xlane.xlu1 %1848 }
 0xf97   :  { %v1853_v33 = vsub.f32 %v1845_v29, %v1849_v32 }
 0xf99   :  { %v1855_v35 = vmul.f32 1.442695, %v1853_v33 }
 0xf9a   :  { %v1852_v57 = vpop.xlane.xlu1 %1851 }
 0xf9b   :  { %v1854_v34 = vsub.f32 %v1846_v49, %v1852_v57 }
 0xf9d   :  { %v1857_v37 = vmul.f32 1.442695, %v1854_v34 }
 0xf9f   :  { %4284 = vpow2.f32 %v1857_v37 }
 0xfa0   :  { %4286 = vpow2.f32 %v1855_v35 }
 0xfa9   :  { %v4285_v39 = vpop.eup %4284 }
 0xfaa   :  { %v1862_v40 = vsel %vm305_vm8, %v4285_v39, 0.0  ;;  %v4287_v43 = vpop.eup %4286 }
 0xfab   :  { %1863 = vadd.xlane.f32.xlu1 %v1862_v40  ;;  %v1859_v44 = vsel %vm305_vm8, %v4287_v43, 0.0 }
 0xfaf   :  { %1860 = vadd.xlane.f32.xlu1 %v1859_v44 }
 0xfc0   :  { %4194 = vrot.lane.b32.xlu1 %v4772_v20, %s4361_s1 }
0x1038   :  { %v1864_v45 = vpop.xlane.xlu1 %1863 }
0x1039   :  { %4288 = vrcp.f32 %v1864_v45 }
0x103c   :  { %v1861_v46 = vpop.xlane.xlu1 %1860 }
0x103d   :  { %4290 = vrcp.f32 %v1861_v46 }
0x1040   :  { %v4195_v52 = vpop.permute.xlu1 %4194 }
0x1041   :  { %v4197_v59 = vunpack.i.h.bf16 %v4195_v52  ;;  %v4196_v60 = vunpack.i.l.bf16 %v4195_v52 }
0x1043   :  { %v4032_v61 = vpack.c.bf16 %v4197_v59, %v4196_v60  ;;  %v4289_v63 = vpop.eup %4288  ;;  %v3414_v60 = vld [vmem:[%s5054_s3 + $0x28] sm:$0xff] }
0x1044   :  { %v1868_v5 = vmul.f32 %v4289_v63, %v4285_v39  ;;  %3814 = vmatprep.subr.mxu0 %v3414_v60 }
0x1045   :  { %4033 = vmatprep.subr.bf16.mxu1 %v4032_v61  ;;  %3815 = vmatpush3.msra.mxu0 %v3414_v60 }
0x1046   :  { %4035 = vmatpush3.bf16.msra.mxu1 %v4032_v61  ;;  %v3413_v61 = vld [vmem:[%s5054_s3 + $0x20] sm:$0xff] }
0x1047   :  { %v4291_v3 = vpop.eup %4290  ;;  %4038 = vmatprep.subr.msk.bf16.mxu1 %vm4502_vm6, %v4036_v62  ;;  %3819 = vmatprep.subr.mxu0 %v3413_v61 }
0x1048   :  { %v1866_v4 = vmul.f32 %v4291_v3, %v4287_v43 }
0x104a   :  { %3797 = vmatprep.mubr.msk.f32.mxu1 %vm305_vm8, %v1866_v4 }
0x104b   :  { %3798 = vmatmul.mubr.msk.f32.vlgmr.msra.gmra.mrb[16].mxu1 %vm305_vm8, %v1868_v5 }
0x104c   :  { %3804 = vmatprep.mubr.msk.f32.mxu1 %vm215_vm5, %v1957_v0 }
0x104f   :  { %4041 = vmatpush3.bf16.xpose.msk.msra.mxu1 %vm4502_vm6, %v4036_v62 }
0x1056   :  { %3805 = vmatmul.mubr.msk.f32.vlgmr.msra.gmra.mrb[18].mxu1 %vm215_vm5, %v1959_v6 }
0x111e   :  { %v4806_v7 = vpop.f32.mrb[16].mxu1 }
0x111f   :  { %v4808_v54 = vpop.f32.mrb[17].mxu1 }
0x1129   :  { %v3806_v8 = vpop.f32.mrb[18].mxu1 }
0x112a   :  { %v2048_v9 = vmul.f32 0.35355338, %v3806_v8  ;;  %v2038_v10 = vpop.f32.mrb[19].mxu1 }
0x112b   :  { %v2047_v11 = vmul.f32 0.35355338, %v2038_v10 }
0x112c   :  { %v2050_v12 = vsel %vm302_vm7, %v2048_v9, -1e+20 }
0x112d   :  { %v2054_v15 = vsel %vm305_vm8, %v2050_v12, -inf  ;;  %v2049_v36 = vsel %vm301_vm9, %v2047_v11, -1e+20 }
0x112e   :  { %2055 = vmax.xlane.f32.xlu0 %v2054_v15  ;;  %v2051_v17 = vsel %vm305_vm8, %v2049_v36, -inf }
0x112f   :  { %2052 = vmax.xlane.f32.xlu1 %v2051_v17 }
0x1140   :  { %4204 = vrot.lane.b32.xlu1 %v4772_v20, %s4364_s0 }
0x1144   :  { %2322 = vrot.lane.b32.xlu1 %v4766_v19, %s4360_s30 }
0x1148   :  { %2324 = vrot.lane.b32.xlu1 %v4764_v18, %s4360_s30 }
0x114c   :  { %4214 = vrot.lane.b32.xlu1 %v4772_v20, %s4362_s15 }
0x1150   :  { %2611 = vrot.lane.b32.xlu1 %v4764_v18, %s4363_s16 }
0x11bb   :  { %v2056_v41 = vpop.xlane.xlu0 %2055 }
0x11bc   :  { %v2058_v51 = vsub.f32 %v2050_v12, %v2056_v41  ;;  %v2053_v21 = vpop.xlane.xlu1 %2052 }
0x11bd   :  { %v2057_v24 = vsub.f32 %v2049_v36, %v2053_v21 }
0x11be   :  { %v2061_v25 = vmul.f32 1.442695, %v2058_v51 }
0x11bf   :  { %v2059_v26 = vmul.f32 1.442695, %v2057_v24 }
0x11c0   :  { %4292 = vpow2.f32 %v2061_v25  ;;  %v4205_v38 = vpop.permute.xlu1 %4204 }
0x11c1   :  { %v4207_v27 = vunpack.i.h.bf16 %v4205_v38  ;;  %v4206_v28 = vunpack.i.l.bf16 %v4205_v38  ;;  %4294 = vpow2.f32 %v2059_v26 }
0x11c3   :  { %v4042_v29 = vpack.c.bf16 %v4207_v27, %v4206_v28 }
0x11c4   :  { %v2323_v32 = vpop.permute.xlu1 %2322 }
0x11c5   :  { %4043 = vmatprep.subr.bf16.mxu1 %v4042_v29 }
0x11c6   :  { %4045 = vmatpush3.bf16.msra.mxu1 %v4042_v29 }
0x11c8   :  { %v2325_v34 = vpop.permute.xlu1 %2324 }
0x11ca   :  { %v4293_v31 = vpop.eup %4292 }
0x11cb   :  { %v2066_v49 = vsel %vm305_vm8, %v4293_v31, 0.0  ;;  %v4295_v48 = vpop.eup %4294 }
0x11cc   :  { %2067 = vadd.xlane.f32.xlu0 %v2066_v49  ;;  %v2063_v18 = vsel %vm305_vm8, %v4295_v48, 0.0  ;;  %v4215_v43 = vpop.permute.xlu1 %4214 }
0x11cd   :  { %v4217_v46 = vunpack.i.h.bf16 %v4215_v43  ;;  %v4216_v47 = vunpack.i.l.bf16 %v4215_v43 }
0x11cf   :  { %v4056_v53 = vpack.c.bf16 %v4217_v46, %v4216_v47 }
0x11d0   :  { %2064 = vadd.xlane.f32.xlu0 %v2063_v18  ;;  %v2612_v59 = vpop.permute.xlu1 %2611 }
0x11e6   :  { %4209 = vrot.lane.b32.xlu0 %v4772_v20, %s4359_s29 }
0x11ea   :  { %2609 = vrot.lane.b32.xlu0 %v4766_v19, %s4363_s16 }
0x1259   :  { %v2068_v33 = vpop.xlane.xlu0 %2067 }
0x125a   :  { %4296 = vrcp.f32 %v2068_v33 }
0x125d   :  { %v2065_v57 = vpop.xlane.xlu0 %2064 }
0x125e   :  { %4298 = vrcp.f32 %v2065_v57 }
0x1261   :  { %v4210_v35 = vpop.permute.xlu0 %4209 }
0x1262   :  { %v4212_v37 = vunpack.i.h.bf16 %v4210_v35  ;;  %v4211_v39 = vunpack.i.l.bf16 %v4210_v35 }
0x1264   :  { %v4046_v40 = vpack.c.bf16 %v4212_v37, %v4211_v39  ;;  %v4297_v44 = vpop.eup %4296 }
0x1265   :  { %v2072_v19 = vmul.f32 %v4297_v44, %v4293_v31  ;;  %v2610_v55 = vpop.permute.xlu0 %2609 }
0x1266   :  { %4048 = vmatprep.subr.msk.bf16.mxu1 %vm4502_vm6, %v4046_v40 }
0x1268   :  { %v4299_v45 = vpop.eup %4298 }
0x1269   :  { %v2070_v52 = vmul.f32 %v4299_v45, %v4295_v48  ;;  %v3415_v45 = vld [vmem:[%s5054_s3 + $0x30] sm:$0xff] }
0x126b   :  { %3811 = vmatprep.mubr.msk.f32.mxu1 %vm305_vm8, %v2070_v52 }
0x126c   :  { %3812 = vmatmul.mubr.msk.f32.vlgmr.msra.gmra.mrb[20].mxu1 %vm305_vm8, %v2072_v19 }
0x126d   :  { %4051 = vmatpush3.bf16.xpose.msk.msra.mxu1 %vm4502_vm6, %v4046_v40  ;;  %3828 = vmatprep.mubr.msk.f32.mxu1 %vm215_vm5, %v2323_v32 }
0x126e   :  { %4058 = vmatprep.subr.msk.bf16.mxu1 %vm4502_vm6, %v4056_v53 }
0x1274   :  { %3829 = vmatmul.mubr.msk.f32.vlgmr.msra.gmra.mrb[22].mxu1 %vm215_vm5, %v2325_v34 }
0x1275   :  { %4061 = vmatpush3.bf16.xpose.msk.msra.mxu1 %vm4502_vm6, %v4056_v53  ;;  %3847 = vmatprep.mubr.msk.f32.mxu1 %vm215_vm5, %v2610_v55 }
0x127c   :  { %3848 = vmatmul.mubr.msk.f32.vlgmr.msra.gmra.mrb[24].mxu1 %vm215_vm5, %v2612_v59 }
0x133f   :  { %v3813_v62 = vpop.f32.mrb[20].mxu1 }
0x1340   :  { %v2151_v63 = vpop.f32.mrb[21].mxu1 }
0x1341   :  { %3816 = vmatprep.mubr.msk.f32.mxu0 %vm215_vm5, %v2151_v63 }
0x1342   :  { %3817 = vmatmul.mubr.msk.f32.vlgmr.msra.gmra.mrb[12].mxu0 %vm215_vm5, %v3813_v62 }
0x1343   :  { %3821 = vmatprep.mubr.msk.f32.mxu0 %vm215_vm5, %v4808_v54  ;;  %3820 = vmatpush3.msra.mxu0 %v3413_v61 }
0x1347   :  { %v3830_v2 = vpop.f32.mrb[22].mxu1 }
0x1348   :  { %v2414_v3 = vmul.f32 0.35355338, %v3830_v2  ;;  %v2404_v4 = vpop.f32.mrb[23].mxu1 }
0x1349   :  { %v2413_v5 = vmul.f32 0.35355338, %v2404_v4 }
0x134a   :  { %3822 = vmatmul.mubr.msk.f32.vlgmr.msra.gmra.mrb[12].mxu0 %vm215_vm5, %v4806_v7  ;;  %v2416_v0 = vsel %vm302_vm7, %v2414_v3, -1e+20 }
0x134b   :  { %v2420_v6 = vsel %vm305_vm8, %v2416_v0, -inf  ;;  %v2415_v8 = vsel %vm301_vm9, %v2413_v5, -1e+20  ;;  %v3416_v5 = vld [vmem:[%s5054_s3 + $0x38] sm:$0xff] }
0x134c   :  { %2421 = vmax.xlane.f32.xlu1 %v2420_v6  ;;  %v2417_v9 = vsel %vm305_vm8, %v2415_v8, -inf }
0x134d   :  { %2418 = vmax.xlane.f32.xlu0 %v2417_v9  ;;  %v2901_v9 = vrot.slane %v4751_v56, %v1359_v42 }
0x134f   :  { %v3849_v54 = vpop.f32.mrb[24].mxu1 }
0x1350   :  { %v2691_v10 = vpop.f32.mrb[25].mxu1  ;;  %v2701_v11 = vmul.f32 0.35355338, %v3849_v54 }
0x1351   :  { %v2700_v12 = vmul.f32 0.35355338, %v2691_v10 }
0x1352   :  { %v2703_v36 = vsel %vm302_vm7, %v2701_v11, -1e+20 }
0x1353   :  { %v2702_v15 = vsel %vm301_vm9, %v2700_v12, -1e+20  ;;  %v2707_v17 = vsel %vm305_vm8, %v2703_v36, -inf }
0x1354   :  { %v2704_v7 = vsel %vm305_vm8, %v2702_v15, -inf }
0x1355   :  { %2705 = vmax.xlane.f32.xlu1 %v2704_v7 }
0x1359   :  { %2708 = vmax.xlane.f32.xlu1 %v2707_v17 }
0x13d9   :  { %v2422_v41 = vpop.xlane.xlu1 %2421 }
0x13da   :  { %v2424_v51 = vsub.f32 %v2416_v0, %v2422_v41  ;;  %v2419_v21 = vpop.xlane.xlu0 %2418 }
0x13db   :  { %v2423_v24 = vsub.f32 %v2415_v8, %v2419_v21 }
0x13dc   :  { %v2427_v25 = vmul.f32 1.442695, %v2424_v51 }
0x13dd   :  { %v2425_v26 = vmul.f32 1.442695, %v2423_v24 }
0x13de   :  { %4300 = vpow2.f32 %v2427_v25 }
0x13df   :  { %4302 = vpow2.f32 %v2425_v26 }
0x13e2   :  { %v2706_v38 = vpop.xlane.xlu1 %2705 }
0x13e3   :  { %v2710_v14 = vsub.f32 %v2702_v15, %v2706_v38 }
0x13e5   :  { %v2712_v31 = vmul.f32 1.442695, %v2710_v14  ;;  %v3417_v14 = vld [vmem:[%s5055_s4 + $0x20] sm:$0xff] }
0x13e6   :  { %v2709_v27 = vpop.xlane.xlu1 %2708 }
0x13e7   :  { %v2711_v28 = vsub.f32 %v2703_v36, %v2709_v27  ;;  %v3418_v27 = vld [vmem:[%s5055_s4 + $0x28] sm:$0xff] }
0x13e8   :  { %v4301_v29 = vpop.eup %4300 }
0x13e9   :  { %v2714_v49 = vmul.f32 1.442695, %v2711_v28  ;;  %v2432_v13 = vsel %vm305_vm8, %v4301_v29, 0.0  ;;  %v4303_v48 = vpop.eup %4302  ;;  %v3419_v28 = vld [vmem:[%s5055_s4 + $0x30] sm:$0xff] }
0x13ea   :  { %2433 = vadd.xlane.f32.xlu0 %v2432_v13  ;;  %v2429_v18 = vsel %vm305_vm8, %v4303_v48, 0.0  ;;  %v3421_v13 = vld [vmem:[%s5056_s5 + $0x80] sm:$0xff] }
0x13eb   :  { %4304 = vpow2.f32 %v2714_v49 }
0x13ec   :  { %4306 = vpow2.f32 %v2712_v31  ;;  %v3420_v31 = vld [vmem:[%s5055_s4 + $0x38] sm:$0xff] }
0x13ed   :  { %v4070_v49 = vpack.c.bf16 %v3420_v31, %v3419_v28 }
0x13ee   :  { %2430 = vadd.xlane.f32.xlu0 %v2429_v18  ;;  %v3423_v18 = vld [vmem:[%s5056_s5 + $0x90] sm:$0xff] }
0x13f5   :  { %v4305_v32 = vpop.eup %4304 }
0x13f6   :  { %v2719_v33 = vsel %vm305_vm8, %v4305_v32, 0.0  ;;  %v4307_v57 = vpop.eup %4306 }
0x13f7   :  { %2720 = vadd.xlane.f32.xlu1 %v2719_v33  ;;  %v2716_v34 = vsel %vm305_vm8, %v4307_v57, 0.0  ;;  %v3424_v33 = vld [vmem:[%s5056_s5 + $0x98] sm:$0xff] }
0x13fb   :  { %2717 = vadd.xlane.f32.xlu1 %v2716_v34  ;;  %v3425_v34 = vld [vmem:[%s5056_s5 + $0xa0] sm:$0xff] }
0x1404   :  { %4219 = vrot.lane.b32.xlu0 %v4772_v20, %s4365_s21 }
0x140c   :  { %4224 = vrot.lane.b32.xlu1 %v4772_v20, %s4366_s24 }
0x1477   :  { %v2434_v35 = vpop.xlane.xlu0 %2433 }
0x1478   :  { %4308 = vrcp.f32 %v2434_v35  ;;  %v3426_v35 = vld [vmem:[%s5056_s5 + $0xa8] sm:$0xff] }
0x147b   :  { %v2431_v37 = vpop.xlane.xlu0 %2430 }
0x147c   :  { %4310 = vrcp.f32 %v2431_v37  ;;  %v4082_v37 = vpack.c.bf16 %v3426_v35, %v3425_v34 }
0x147f   :  { %v4220_v39 = vpop.permute.xlu0 %4219 }
0x1480   :  { %v4222_v40 = vunpack.i.h.bf16 %v4220_v39  ;;  %v4221_v43 = vunpack.i.l.bf16 %v4220_v39  ;;  %v3427_v39 = vld [vmem:[%s5056_s5 + $0xb0] sm:$0xff] }
0x1482   :  { %v4052_v44 = vpack.c.bf16 %v4222_v40, %v4221_v43  ;;  %v4309_v47 = vpop.eup %4308  ;;  %v3428_v40 = vld [vmem:[%s5056_s5 + $0xb8] sm:$0xff] }
0x1483   :  { %v2438_v20 = vmul.f32 %v4309_v47, %v4301_v29  ;;  %v4066_v29 = vpack.c.bf16 %v3418_v27, %v3417_v14  ;;  %v4086_v43 = vpack.c.bf16 %v3428_v40, %v3427_v39  ;;  %v3431_v47 = vld [vmem:[%s5056_s5 + $0xd0] sm:$0xff] }
0x1484   :  { %v2721_v46 = vpop.xlane.xlu1 %2720  ;;  %4053 = vmatprep.subr.bf16.mxu0 %v4052_v44 }
0x1485   :  { %4055 = vmatpush3.bf16.msra.mxu0 %v4052_v44  ;;  %4067 = vmatprep.subr.bf16.mxu1 %v4066_v29  ;;  %v3429_v44 = vld [vmem:[%s5056_s5 + $0xc0] sm:$0xff] }
0x1486   :  { %v4311_v52 = vpop.eup %4310  ;;  %3838 = vmatprep.subr.mxu0 %v3415_v45  ;;  %4069 = vmatpush3.bf16.msra.mxu1 %v4066_v29 }
0x1487   :  { %v2436_v19 = vmul.f32 %v4311_v52, %v4303_v48  ;;  %4071 = vmatprep.subr.bf16.mxu1 %v4070_v49  ;;  %v3422_v48 = vld [vmem:[%s5056_s5 + $0x88] sm:$0xff]  ;;  %v3432_v52 = vld [vmem:[%s5056_s5 + $0xd8] sm:$0xff] }
0x1488   :  { %v2718_v53 = vpop.xlane.xlu1 %2717 }
0x1489   :  { %3835 = vmatprep.mubr.msk.f32.mxu0 %vm305_vm8, %v2436_v19  ;;  %4312 = vrcp.f32 %v2718_v53  ;;  %v4094_v19 = vpack.c.bf16 %v3432_v52, %v3431_v47  ;;  %v3434_v53 = vld [vmem:[%s5056_s5 + $0xe8] sm:$0xff]  ;;  %v3168_v47 = vld [vmem:[%s5058_s7 + $0x10] sm:$0xff]  ;;  %v3169_v52 = vld [vmem:[%s5058_s7 + $0x18] sm:$0xff] }
0x148a   :  { %3836 = vmatmul.mubr.msk.f32.vlgmr.msra.gmra.mrb[14].mxu0 %vm305_vm8, %v2438_v20  ;;  %4314 = vrcp.f32 %v2721_v46  ;;  %4073 = vmatpush3.bf16.msra.mxu1 %v4070_v49  ;;  %v3433_v20 = vld [vmem:[%s5056_s5 + $0xe0] sm:$0xff]  ;;  %v3046_v49 = vrot.slane %v4751_v56, %v1504_v16 }
0x148b   :  { %3839 = vmatpush3.msra.mxu0 %v3415_v45  ;;  %v3430_v45 = vld [vmem:[%s5056_s5 + $0xc8] sm:$0xff] }
0x148c   :  { %v4225_v55 = vpop.permute.xlu1 %4224  ;;  %v4090_v46 = vpack.c.bf16 %v3430_v45, %v3429_v44  ;;  %v3167_v45 = vld [vmem:[%s5058_s7 + $0x8] sm:$0xff] }
0x148d   :  { %v4227_v59 = vunpack.i.h.bf16 %v4225_v55  ;;  %v4226_v60 = vunpack.i.l.bf16 %v4225_v55  ;;  %v4098_v55 = vpack.c.bf16 %v3434_v53, %v3433_v20 }
0x148f   :  { %v4062_v61 = vpack.c.bf16 %v4227_v59, %v4226_v60 }
0x1491   :  { %4063 = vmatprep.subr.bf16.mxu0 %v4062_v61 }
0x1493   :  { %v4313_v62 = vpop.eup %4312 }
0x1494   :  { %v4315_v3 = vpop.eup %4314  ;;  %v2723_v4 = vmul.f32 %v4313_v62, %v4307_v57  ;;  %v4078_v57 = vpack.c.bf16 %v3424_v33, %v3423_v18 }
0x1495   :  { %v2725_v0 = vmul.f32 %v4315_v3, %v4305_v32  ;;  %v4074_v32 = vpack.c.bf16 %v3422_v48, %v3421_v13 }
0x155d   :  { %v3837_v63 = vpop.f32.mrb[14].mxu0 }
0x155e   :  { %v2517_v2 = vpop.f32.mrb[15].mxu0 }
0x155f   :  { %3840 = vmatprep.mubr.msk.f32.mxu0 %vm215_vm5, %v2517_v2 }
0x1560   :  { %3841 = vmatmul.mubr.msk.f32.vlgmr.msra.gmra.mrb[12].mxu0 %vm215_vm5, %v3837_v63 }
0x1561   :  { %4065 = vmatpush3.bf16.msra.mxu0 %v4062_v61  ;;  %3854 = vmatprep.mubr.msk.f32.mxu0 %vm305_vm8, %v2723_v4 }
0x1562   :  { %3857 = vmatprep.subr.mxu0 %v3416_v5 }
0x1564   :  { %3855 = vmatmul.mubr.msk.f32.vlgmr.msra.gmra.mrb[16].mxu0 %vm305_vm8, %v2725_v0 }
0x1565   :  { %3858 = vmatpush3.msra.mxu0 %v3416_v5 }
0x1566   :  { %4075 = vmatprep.subr.bf16.mxu0 %v4074_v32 }
0x1637   :  { %v3856_v6 = vpop.f32.mrb[16].mxu0 }
0x1638   :  { %v2804_v8 = vpop.f32.mrb[17].mxu0 }
0x1639   :  { %3859 = vmatprep.mubr.msk.f32.mxu0 %vm215_vm5, %v2804_v8 }
0x163a   :  { %3860 = vmatmul.mubr.msk.f32.vlgmr.msra.gmra.mrb[12].mxu0 %vm215_vm5, %v3856_v6 }
0x163b   :  { %4077 = vmatpush3.bf16.msra.mxu0 %v4074_v32 }
0x163c   :  { %4079 = vmatprep.subr.bf16.mxu0 %v4078_v57 }
0x163f   :  { %4081 = vmatpush3.bf16.msra.mxu0 %v4078_v57 }
0x1640   :  { %4083 = vmatprep.subr.bf16.mxu0 %v4082_v37 }
0x1643   :  { %4085 = vmatpush3.bf16.msra.mxu0 %v4082_v37 }
0x1644   :  { %4087 = vmatprep.subr.bf16.mxu0 %v4086_v43 }
0x1647   :  { %4089 = vmatpush3.bf16.msra.mxu0 %v4086_v43 }
0x1648   :  { %4091 = vmatprep.subr.bf16.mxu0 %v4090_v46 }
0x164b   :  { %4093 = vmatpush3.bf16.msra.mxu0 %v4090_v46 }
0x164c   :  { %4095 = vmatprep.subr.bf16.mxu0 %v4094_v19 }
0x164f   :  { %4097 = vmatpush3.bf16.msra.mxu0 %v4094_v19  ;;  %v4110_v19 = vpack.c.bf16 %v3169_v52, %v3168_v47 }
0x1650   :  { %4099 = vmatprep.subr.bf16.mxu0 %v4098_v55 }
0x1653   :  { %4101 = vmatpush3.bf16.msra.mxu0 %v4098_v55 }
0x170d   :  { %v3861_v54 = vpop.f32.mrb[12].mxu0 }
0x170e   :  { %v2897_v10 = vadd.f32 %v3861_v54, %v4726_v23  ;;  %v2885_v11 = vpop.f32.mrb[13].mxu0 }
0x170f   :  { %v2896_v12 = vadd.f32 %v2885_v11, %v4723_v22 }
0x1710   :  { %v4897_v15 = vadd.f32 %v2901_v9, %v2897_v10 }
0x1711   :  { %v4899_v7 = vadd.f32 %v2901_v9, %v2896_v12  ;;  %v2941_v12 = vrot.slane %v4751_v56, %v1399_v50  ;;  %v3435_v50 = vld [vmem:[%s5056_s5 + $0xf0] sm:$0xff] }
0x1712   :  { %v2907_v36 = vsel %vm69_vm0, %v4897_v15, 0.0 }
0x1713   :  { %2908 = vadd.xlane.f32.xlu1 %v2907_v36  ;;  %v2904_v17 = vsel %vm69_vm0, %v4899_v7, 0.0 }
0x1714   :  { %2905 = vadd.xlane.f32.xlu0 %v2904_v17  ;;  %v2953_v17 = vrot.slane %v4751_v56, %v1411_v58  ;;  %v3436_v58 = vld [vmem:[%s5056_s5 + $0xf8] sm:$0xff] }
0x17a0   :  { %v2909_v41 = vpop.xlane.xlu1 %2908 }
0x17a1   :  { %v2911_v42 = vmul.f32 0.03125, %v2909_v41  ;;  %v2906_v51 = vpop.xlane.xlu0 %2905 }
0x17a2   :  { %v2910_v21 = vmul.f32 0.03125, %v2906_v51 }
0x17a3   :  { %v4906_v23 = vsub.f32 %v4897_v15, %v2911_v42 }
0x17a4   :  { %v4909_v22 = vsub.f32 %v4899_v7, %v2910_v21 }
0x17a5   :  { %v2915_v26 = vmul.f32 %v4906_v23, %v4906_v23  ;;  %v2943_v51 = vmul.f32 %v2941_v12, %v4906_v23  ;;  %v2959_v23 = vrot.slane %v4751_v56, %v1417_v1 }
0x17a6   :  { %v2914_v24 = vmul.f32 %v4909_v22, %v4909_v22  ;;  %v2942_v36 = vmul.f32 %v2941_v12, %v4909_v22  ;;  %v4102_v22 = vpack.c.bf16 %v3436_v58, %v3435_v50  ;;  %v3268_v12 = vld [vmem:[%s5059_s8 + $0x10] sm:$0xff] }
0x17a7   :  { %v2919_v38 = vsel %vm69_vm0, %v2915_v26, 0.0 }
0x17a8   :  { %v2916_v25 = vsel %vm69_vm0, %v2914_v24, 0.0  ;;  %4103 = vmatprep.subr.bf16.mxu0 %v4102_v22 }
0x17a9   :  { %2917 = vadd.xlane.f32.xlu0 %v2916_v25  ;;  %4105 = vmatpush3.bf16.msra.mxu0 %v4102_v22 }
0x17ad   :  { %2920 = vadd.xlane.f32.xlu0 %v2919_v38 }
0x1836   :  { %v2918_v59 = vpop.xlane.xlu0 %2917 }
0x1837   :  { %v2922_v60 = vmul.f32 0.032258064, %v2918_v59 }
0x1839   :  { %4316 = vrsqrt.f32 %v2922_v60  ;;  %vm2926_vm3 = vcmp.eq.f32.partialorder %v2922_v60, inf  ;;  %v2929_v3 = vand.u32 2147483648, %v2922_v60  ;;  %vm2928_vm4 = vcmp.eq.f32.partialorder %v2922_v60, 0.0 }
0x183a   :  { %v2921_v61 = vpop.xlane.xlu0 %2920 }
0x183b   :  { %v2923_v62 = vmul.f32 0.032258064, %v2921_v61 }
0x183d   :  { %4318 = vrsqrt.f32 %v2923_v62  ;;  %vm2933_vm5 = vcmp.eq.f32.partialorder %v2923_v62, inf  ;;  %v2936_v9 = vand.u32 2147483648, %v2923_v62  ;;  %vm2935_vm6 = vcmp.eq.f32.partialorder %v2923_v62, 0.0 }
0x1843   :  { %v4317_v63 = vpop.eup %4316 }
0x1844   :  { %v2925_v2 = vmul.f32 %v4317_v63, %v2922_v60  ;;  %v3474_v63 = vld [vmem:[%s5060_s9] ss:$0 sm:$0xff] }
0x1846   :  { %v2927_v4 = vsel %vm2926_vm3, %v2922_v60, %v2925_v2 }
0x1847   :  { %v4319_v5 = vpop.eup %4318  ;;  %v2930_v0 = vsel %vm2928_vm4, %v2929_v3, %v2927_v4  ;;  %v3475_v3 = vld [vmem:[%s5060_s9 + $0x1] ss:$0 sm:$0xff] }
0x1848   :  { %v2932_v6 = vmul.f32 %v4319_v5, %v2923_v62  ;;  %v2944_v8 = vadd.f32 1e-06, %v2930_v0 }
0x184a   :  { %v2934_v54 = vsel %vm2933_vm5, %v2923_v62, %v2932_v6  ;;  %4320 = vrcp.f32 %v2944_v8 }
0x184b   :  { %v2937_v10 = vsel %vm2935_vm6, %v2936_v9, %v2934_v54  ;;  %v3266_v54 = vld [vmem:[%s5059_s8] sm:$0xff] }
0x184c   :  { %v2945_v11 = vadd.f32 1e-06, %v2937_v10  ;;  %v3267_v10 = vld [vmem:[%s5059_s8 + $0x8] sm:$0xff] }
0x184e   :  { %4322 = vrcp.f32 %v2945_v11  ;;  %v4114_v11 = vpack.c.bf16 %v3267_v10, %v3266_v54 }
0x1854   :  { %v4321_v41 = vpop.eup %4320 }
0x1855   :  { %v2947_v42 = vmul.f32 %v4321_v41, %v2942_v36  ;;  %v3269_v36 = vld [vmem:[%s5059_s8 + $0x18] sm:$0xff]  ;;  %v3476_v41 = vld [vmem:[%s5060_s9 + $0x2] ss:$0 sm:$0xff] }
0x1857   :  { %v2954_v21 = vadd.f32 %v2953_v17, %v2947_v42 }
0x1858   :  { %v4323_v24 = vpop.eup %4322 }
0x1859   :  { %v2949_v25 = vmul.f32 %v4323_v24, %v2943_v51  ;;  %3870 = vmatprep.mubr.msk.f32.mxu1 %vm69_vm0, %v2954_v21 }
0x185b   :  { %v2955_v26 = vadd.f32 %v2953_v17, %v2949_v25  ;;  %v4118_v17 = vpack.c.bf16 %v3269_v36, %v3268_v12 }
0x185d   :  { %3871 = vmatmul.mubr.msk.f32.vlgmr.msra.gmra.mrb[26].mxu1 %vm69_vm0, %v2955_v26 }
0x1930   :  { %v3872_v38 = vpop.f32.mrb[26].mxu1 }
0x1931   :  { %v3038_v14 = vadd.f32 %v3872_v38, %v2959_v23  ;;  %v3032_v27 = vpop.f32.mrb[27].mxu1 }
0x1932   :  { %v3033_v28 = vadd.f32 %v3032_v27, %v2959_v23 }
0x1933   :  { %v3042_v31 = vmax.f32 %v3038_v14, 0.0 }
0x1934   :  { %v3041_v29 = vmax.f32 %v3033_v28, 0.0 }
0x1936   :  { %3905 = vmatprep.mubr.f32.mxu0 %v3041_v29  ;;  %v3479_v29 = vld [vmem:[%s5060_s9 + $0x3] ss:$0 sm:$0xff] }
0x1937   :  { %3906 = vmatmul.mubr.f32.vlgmr.msra.gmra.mrb[18].mxu0 %v3042_v31 }
0x1a0a   :  { %v3907_v13 = vpop.f32.mrb[18].mxu0 }
0x1a0b   :  { %v3113_v48 = vpop.f32.mrb[19].mxu0  ;;  %v3119_v18 = vadd.f32 %v3907_v13, %v3046_v49 }
0x1a0c   :  { %v3114_v32 = vadd.f32 %v3113_v48, %v3046_v49 }
0x1a0d   :  { %v3123_v57 = vadd.f32 %v3119_v18, %v4897_v15  ;;  %v3166_v15 = vld [vmem:[%s5058_s7] sm:$0xff] }
0x1a0e   :  { %v3122_v33 = vadd.f32 %v3114_v32, %v4899_v7  ;;  %v4106_v46 = vpack.c.bf16 %v3167_v45, %v3166_v15 }
0x1a0f   :  { %v3131_v34 = vsel %vm69_vm0, %v3123_v57, 0.0 }
0x1a10   :  { %v3128_v1 = vsel %vm69_vm0, %v3122_v33, 0.0  ;;  %4107 = vmatprep.subr.bf16.mxu1 %v4106_v46 }
0x1a11   :  { %3129 = vadd.xlane.f32.xlu0 %v3128_v1  ;;  %4109 = vmatpush3.bf16.msra.mxu1 %v4106_v46 }
0x1a12   :  { %4111 = vmatprep.subr.bf16.mxu1 %v4110_v19 }
0x1a15   :  { %3132 = vadd.xlane.f32.xlu0 %v3131_v34  ;;  %4113 = vmatpush3.bf16.msra.mxu1 %v4110_v19 }
0x1a16   :  { %4115 = vmatprep.subr.bf16.mxu1 %v4114_v11 }
0x1a9e   :  { %v3130_v35 = vpop.xlane.xlu0 %3129 }
0x1a9f   :  { %v3134_v37 = vmul.f32 0.03125, %v3130_v35 }
0x1aa1   :  { %v3136_v39 = vsub.f32 %v3122_v33, %v3134_v37 }
0x1aa2   :  { %v3133_v30 = vpop.xlane.xlu0 %3132 }
0x1aa3   :  { %v3135_v40 = vmul.f32 0.03125, %v3133_v30  ;;  %v3138_v16 = vmul.f32 %v3136_v39, %v3136_v39 }
0x1aa5   :  { %v3137_v56 = vsub.f32 %v3123_v57, %v3135_v40  ;;  %v3140_v43 = vsel %vm69_vm0, %v3138_v16, 0.0 }
0x1aa6   :  { %3141 = vadd.xlane.f32.xlu0 %v3140_v43 }
0x1aa7   :  { %v3139_v44 = vmul.f32 %v3137_v56, %v3137_v56 }
0x1aa9   :  { %v3143_v7 = vsel %vm69_vm0, %v3139_v44, 0.0 }
0x1aaa   :  { %3144 = vadd.xlane.f32.xlu1 %v3143_v7 }
0x1b33   :  { %v3142_v20 = vpop.xlane.xlu0 %3141 }
0x1b34   :  { %v3146_v53 = vmul.f32 0.03125, %v3142_v20 }
0x1b36   :  { %v3148_v55 = vadd.f32 1e-05, %v3146_v53 }
0x1b37   :  { %v3145_v59 = vpop.xlane.xlu1 %3144 }
0x1b38   :  { %4324 = vrsqrt.f32 %v3148_v55  ;;  %v3147_v60 = vmul.f32 0.03125, %v3145_v59 }
0x1b3a   :  { %v3149_v61 = vadd.f32 1e-05, %v3147_v60 }
0x1b3c   :  { %4326 = vrsqrt.f32 %v3149_v61 }
0x1b42   :  { %v4325_v62 = vpop.eup %4324 }
0x1b43   :  { %v3152_v2 = vmul.f32 %v4325_v62, %v3136_v39 }
0x1b45   :  { %v3158_v4 = vmul.f32 %v3474_v63, %v3152_v2 }
0x1b46   :  { %v4327_v5 = vpop.eup %4326 }
0x1b47   :  { %v3153_v0 = vmul.f32 %v4327_v5, %v3137_v56  ;;  %v3164_v6 = vadd.f32 %v3475_v3, %v3158_v4 }
0x1b49   :  { %v3159_v8 = vmul.f32 %v3474_v63, %v3153_v0  ;;  %3916 = vmatprep.mubr.msk.f32.mxu1 %vm69_vm0, %v3164_v6 }
0x1b4b   :  { %v3165_v9 = vadd.f32 %v3475_v3, %v3159_v8 }
0x1b4d   :  { %3917 = vmatmul.mubr.msk.f32.vlgmr.msra.gmra.mrb[28].mxu1 %vm69_vm0, %v3165_v9 }
0x1b4e   :  { %4117 = vmatpush3.bf16.msra.mxu1 %v4114_v11 }
0x1b4f   :  { %4119 = vmatprep.subr.bf16.mxu1 %v4118_v17 }
0x1b52   :  { %4121 = vmatpush3.bf16.msra.mxu1 %v4118_v17 }
0x1c20   :  { %v3918_v42 = vpop.f32.mrb[28].mxu1 }
0x1c21   :  { %v3252_v51 = vadd.f32 %v3918_v42, %v3476_v41  ;;  %v3246_v21 = vpop.f32.mrb[29].mxu1 }
0x1c22   :  { %v3247_v24 = vadd.f32 %v3476_v41, %v3246_v21 }
0x1c23   :  { %v3259_v25 = vmul.f32 0.70710677, %v3252_v51  ;;  %v3256_v14 = vmul.f32 0.5, %v3252_v51 }
0x1c24   :  { %v3258_v26 = vmul.f32 0.70710677, %v3247_v24  ;;  %v3255_v23 = vmul.f32 0.5, %v3247_v24 }
0x1c25   :  { %4328 = verf.f32 %v3259_v25 }
0x1c26   :  { %4330 = verf.f32 %v3258_v26 }
0x1c2f   :  { %v4329_v50 = vpop.eup %4328 }
0x1c30   :  { %v4331_v58 = vpop.eup %4330  ;;  %v3263_v22 = vadd.f32 1.0, %v4329_v50 }
0x1c31   :  { %v3262_v38 = vadd.f32 1.0, %v4331_v58 }
0x1c32   :  { %v3265_v28 = vmul.f32 %v3263_v22, %v3256_v14 }
0x1c33   :  { %v3264_v27 = vmul.f32 %v3262_v38, %v3255_v23 }
0x1c35   :  { %3927 = vmatprep.mubr.msk.f32.mxu1 %vm69_vm0, %v3264_v27 }
0x1c36   :  { %3928 = vmatmul.mubr.msk.f32.vlgmr.msra.gmra.mrb[30].mxu1 %vm69_vm0, %v3265_v28 }
0x1d09   :  { %v3929_v31 = vpop.f32.mrb[30].mxu1 }
0x1d0a   :  { %v3352_v49 = vadd.f32 %v3929_v31, %v3479_v29  ;;  %v3346_v13 = vpop.f32.mrb[31].mxu1 }
0x1d0b   :  { %v3347_v48 = vadd.f32 %v3479_v29, %v3346_v13 }
0x1d0c   :  { %3356 = vst [vmem:[#allocation2 + $0x8] sm:$0xff] %v3352_v49 }
0x1d0d   :  { %3355 = vst [vmem:[#allocation2] sm:$0xff] %v3347_v48 }
0x1d0e   :  { %4343 = shalt.err (!%p4340_p4)
}
0x1d0f   :  { %s4344_s9 = scalar_lea.hbm %s5061_s10, 256 }
0x1d10   :  { %p4345_p5 = scmp.ne.s32.totalorder %s5061_s10, %s4344_s9  ;;  %p4348_p6 = scmp.lt.u32.totalorder %s4344_s9, %s5061_s10 }
0x1d12   :  { %p4350_p7 = pnand %p4348_p6, %p4345_p5 }
0x1d14   :  { %4353 = shalt.err (!%p4350_p7)
}
0x1d15   :  { %s4368_s18 = smov 128   ;;  %s4369_s6 = smov 8  }
0x1d16   :  { %3368 = dma.vmem_to_hbm [thread:$0]  %s3363_s11, 256, %s5061_s10, [#allocation3], %s4368_s18, %s4368_s18, %s4369_s6  }
0x1d17   :  { %4354 = dma.done.wait [#allocation3], 256  }
0x1d18   :  { %4355 = vsyncadd [#allocation3], 4294967040 }
0x1d19   :  { %3372 = vsyncpa [#allocation3], 1 }

</bundles_post_ra>
